<compile_context>
chip_gen: v6e
topology: v6e:2x2x1
jax: 0.10.0
libtpu: 0.0.40
codegen_flags: <defaults>
</compile_context>

<pallas_src>
import functools

import jax
import jax.numpy as jnp
from jax import lax
from jax.experimental import pallas as pl
from jax.experimental.pallas import tpu as pltpu

EPS = 1e-5


# ----------------------------- Pallas kernels -----------------------------

def _matmul_affine_kernel(x_ref, w_ref, s_ref, b_ref, m_ref, o_ref):
    # x: (tm, K)  w: (K, N)  s/b/m: (1, N)  o: (tm, N)
    acc = jnp.dot(x_ref[...], w_ref[...], preferred_element_type=jnp.float32)
    y = acc * s_ref[...] + b_ref[...]
    # per-column ReLU mask (lets one matmul produce both ReLU'd and linear branches)
    y = jnp.where(m_ref[...] > 0.0, jnp.maximum(y, 0.0), y)
    o_ref[...] = y.astype(o_ref.dtype)


def matmul_affine(x, w, scale, bias, relu_mask, *, tm=256):
    """out = maybe_relu((x @ w) * scale + bias); batch already fused into M, grid over M tiles."""
    M, K = x.shape
    K2, N = w.shape
    assert K2 == K
    tm = tm if M % tm == 0 else M
    return pl.pallas_call(
        _matmul_affine_kernel,
        out_shape=jax.ShapeDtypeStruct((M, N), x.dtype),
        grid=(M // tm,),
        in_specs=[
            pl.BlockSpec((tm, K), lambda i: (i, 0)),
            pl.BlockSpec((K, N), lambda i: (0, 0)),
            pl.BlockSpec((1, N), lambda i: (0, 0)),
            pl.BlockSpec((1, N), lambda i: (0, 0)),
            pl.BlockSpec((1, N), lambda i: (0, 0)),
        ],
        out_specs=pl.BlockSpec((tm, N), lambda i: (i, 0)),
        compiler_params=pltpu.CompilerParams(dimension_semantics=("parallel",)),
    )(x, w, scale, bias, relu_mask)


def _splat_residual_kernel(x2_ref, a_ref, ycat_ref, o_ref, *, C):
    # x2: (1, HW, 2C) radix-conv activations; a: (1, 1, 2C) rSoftMax attention;
    # ycat: (1, HW, 2C) whose columns [C:2C] hold the downsample residual; o: (1, HW, C)
    w = x2_ref[0] * a_ref[0]                         # attention apply (VPU)
    out = w[:, :C] + w[:, C:]                        # radix sum via slice+add (no MXU/sel matrix)
    out = jnp.maximum(out, 0.0)                      # ReLU after SplAtConv2d
    res = ycat_ref[0][:, C:]                         # residual branch (bn(conv1x1(x)))
    out = jnp.maximum(out + res, 0.0)                # + residual, final ReLU
    o_ref[0] = out.astype(o_ref.dtype)


def splat_residual(x2, attn, ycat, C):
    B, HW, C2 = x2.shape
    kern = functools.partial(_splat_residual_kernel, C=C)
    return pl.pallas_call(
        kern,
        out_shape=jax.ShapeDtypeStruct((B, HW, C), x2.dtype),
        grid=(B,),
        in_specs=[
            pl.BlockSpec((1, HW, C2), lambda b: (b, 0, 0)),
            pl.BlockSpec((1, 1, C2), lambda b: (b, 0, 0)),
            pl.BlockSpec((1, HW, C2), lambda b: (b, 0, 0)),
        ],
        out_specs=pl.BlockSpec((1, HW, C), lambda b: (b, 0, 0)),
        compiler_params=pltpu.CompilerParams(dimension_semantics=("parallel",)),
    )(x2, attn, ycat)


# ----------------------------- plain-JAX glue -----------------------------

def im2col3x3(x_nhwc, H, W):
    B = x_nhwc.shape[0]
    Cin = x_nhwc.shape[-1]
    xp = jnp.pad(x_nhwc, ((0, 0), (1, 1), (1, 1), (0, 0)))
    patches = [xp[:, kh:kh + H, kw:kw + W, :] for kh in range(3) for kw in range(3)]
    p = jnp.stack(patches, axis=3)                                   # (B, H, W, 9, Cin)
    return p.reshape(B, H * W, 9 * Cin)                              # order: (kh, kw, cin)


def fold_bn(gamma, beta, mean, var, conv_bias=None):
    scale = gamma / jnp.sqrt(var + EPS)
    bias = beta - mean * scale
    if conv_bias is not None:
        bias = bias + conv_bias * scale
    return scale.reshape(1, -1), bias.reshape(1, -1)


def block_diag_1x1(wg):  # (G, Ci, Co) -> dense (G*Ci, G*Co)
    G, Ci, Co = wg.shape
    W = jnp.zeros((G * Ci, G * Co), wg.dtype)
    for g in range(G):
        W = W.at[g * Ci:(g + 1) * Ci, g * Co:(g + 1) * Co].set(wg[g])
    return W


def block_diag_3x3(wg):  # (G, 3, 3, Ci, Co) -> dense (3, 3, G*Ci, G*Co)
    G, KH, KW, Ci, Co = wg.shape
    W = jnp.zeros((KH, KW, G * Ci, G * Co), wg.dtype)
    for g in range(G):
        W = W.at[:, :, g * Ci:(g + 1) * Ci, g * Co:(g + 1) * Co].set(wg[g])
    return W


def rsoftmax(a, radix, card):
    # matches rSoftMax: view(B, card, radix, -1).transpose(1,2).softmax(dim=1).reshape(B,-1)
    B, K = a.shape
    Cq = K // (radix * card)
    a = a.reshape(B, card, radix, Cq)
    a = jax.nn.softmax(a, axis=2)
    return jnp.transpose(a, (0, 2, 1, 3)).reshape(B, K)


# ----------------------------- parameters -----------------------------

def init_params(key, ch_in, ch_out):
    C = ch_out
    radix, card = 2, 2
    inter = max(C * radix // 4, 32)
    ks = jax.random.split(key, 12)

    def nrm(k, shape, scale=0.1):
        return scale * jax.random.normal(k, shape, jnp.float32)

    def bn_params(k, n):
        k1, k2, k3, k4 = jax.random.split(k, 4)
        gamma = 1.0 + 0.1 * jax.random.normal(k1, (n,), jnp.float32)
        beta = 0.1 * jax.random.normal(k2, (n,), jnp.float32)
        mean = 0.1 * jax.random.normal(k3, (n,), jnp.float32)
        var = 0.5 + jax.random.uniform(k4, (n,), jnp.float32)
        return gamma, beta, mean, var

    G = card * radix
    P = {
        "w1": nrm(ks[0], (3, 3, ch_in, C)),                          # conv 3x3, no bias
        "bn1": bn_params(ks[1], C),
        "w2g": nrm(ks[2], (G, 3, 3, C // G, (C * radix) // G)),      # SplAt radix conv, groups=4
        "b2": nrm(ks[3], (C * radix,)),
        "bn0s": bn_params(ks[4], C * radix),
        "wfc1g": nrm(ks[5], (card, C // card, inter // card)),       # fc1, groups=2
        "bfc1": nrm(ks[6], (inter,)),
        "bn1s": bn_params(ks[7], inter),
        "wfc2g": nrm(ks[8], (card, inter // card, (C * radix) // card)),  # fc2, groups=2
        "bfc2": nrm(ks[9], (C * radix,)),
        "wd": nrm(ks[10], (ch_in, C)),                               # downsample 1x1, no bias
        "bnd": bn_params(ks[11], C),
    }
    return P


def prepare_params(P):
    """Precompute (once) folded BN scales/biases, dense block-diagonal grouped weights and the
    fused conv1+downsample weight.  Done outside the per-step forward (no per-call rebuild)."""
    KH, KW, Cin, C = P["w1"].shape
    radix = 2

    # conv1 (3x3) and downsample (1x1) share the same im2col input -> concat along N.
    w1 = P["w1"].reshape(9 * Cin, C)
    wd_pad = jnp.zeros((9 * Cin, C), jnp.float32).at[4 * Cin:5 * Cin, :].set(P["wd"])  # center tap
    w_cat = jnp.concatenate([w1, wd_pad], axis=1)                    # (9*Cin, 2C)
    s1, b1 = fold_bn(*P["bn1"])
    sd, bd = fold_bn(*P["bnd"])
    s_cat = jnp.concatenate([s1, sd], axis=1)
    b_cat = jnp.concatenate([b1, bd], axis=1)
    m_cat = jnp.concatenate([jnp.ones((1, C), jnp.float32),          # ReLU on conv1 columns
                             jnp.zeros((1, C), jnp.float32)], axis=1)  # no ReLU on residual

    # SplAt radix conv: grouped 3x3 (groups=4) as block-diagonal dense weight.
    w2 = block_diag_3x3(P["w2g"]).reshape(9 * C, radix * C)
    s2, b2 = fold_bn(*P["bn0s"], conv_bias=P["b2"])
    m2 = jnp.ones((1, radix * C), jnp.float32)

    # Attention MLP (grouped 1x1 convs) as dense block-diagonal weights (tiny, runs in XLA).
    wfc1 = block_diag_1x1(P["wfc1g"])
    sf1, bf1 = fold_bn(*P["bn1s"], conv_bias=P["bfc1"])
    wfc2 = block_diag_1x1(P["wfc2g"])
    bfc2 = P["bfc2"].reshape(1, -1)

    return dict(w_cat=w_cat, s_cat=s_cat, b_cat=b_cat, m_cat=m_cat,
                w2=w2, s2=s2, b2=b2, m2=m2,
                wfc1=wfc1, sf1=sf1, bf1=bf1, wfc2=wfc2, bfc2=bfc2)


# ----------------------------- forward (Pallas path) -----------------------------

def res_conv_block_forward(x_nchw, prep, ch_out):
    C = ch_out
    radix, card = 2, 2
    B, Cin, H, W = x_nchw.shape
    HW = H * W
    x = jnp.transpose(x_nchw, (0, 2, 3, 1))                          # NHWC

    # Fused [conv1 3x3 + BN + ReLU | downsample 1x1 + BN] in a single Pallas matmul,
    # batch fused into M, output columns [0:C]=y1, [C:2C]=residual.
    cols1 = im2col3x3(x, H, W).reshape(B * HW, 9 * Cin)
    ycat = matmul_affine(cols1, prep["w_cat"], prep["s_cat"], prep["b_cat"], prep["m_cat"])
    y1 = ycat[:, :C]                                                 # relu(bn(conv3x3(x)))

    # SplAt radix conv: grouped 3x3 (groups=4) + bias + BN + ReLU (batch fused into M).
    cols2 = im2col3x3(y1.reshape(B, H, W, C), H, W).reshape(B * HW, 9 * C)
    x2 = matmul_affine(cols2, prep["w2"], prep["s2"], prep["b2"], prep["m2"])  # (B*HW, 2C)
    x2_b = x2.reshape(B, HW, radix * C)

    # Tiny attention path (gap -> fc1 -> fc2 -> rSoftMax): left to XLA (B x C scalars).
    gap = jnp.mean(x2_b[..., :C] + x2_b[..., C:], axis=1)            # radix sum + GAP, (B, C)
    g1 = jax.nn.relu(jnp.dot(gap, prep["wfc1"]) * prep["sf1"] + prep["bf1"])
    a = jnp.dot(g1, prep["wfc2"]) + prep["bfc2"]                     # (B, 2C)
    attn = rsoftmax(a, radix, card).reshape(B, 1, radix * C)

    # Fused epilogue: attention apply + radix sum + ReLU + residual add + final ReLU.
    out = splat_residual(x2_b, attn, ycat.reshape(B, HW, radix * C), C)  # (B, HW, C)
    return jnp.transpose(out.reshape(B, H, W, C), (0, 3, 1, 2))      # back to NCHW


# ----------------------------- pure-JAX reference (for verification) -----------------------------

def reference_forward(x, P, ch_in, ch_out):
    C = ch_out
    radix, card = 2, 2
    prec = lax.Precision.HIGHEST

    def bn(y, stats):
        g, b, m, v = stats
        inv = g / jnp.sqrt(v + EPS)
        return (y - m[None, :, None, None]) * inv[None, :, None, None] + b[None, :, None, None]

    def conv(y, w, pad, groups=1):
        return lax.conv_general_dilated(
            y, w, (1, 1), [(pad, pad), (pad, pad)],
            feature_group_count=groups,
            dimension_numbers=("NCHW", "OIHW", "NCHW"),
            precision=prec)

    w1_oihw = jnp.transpose(P["w1"], (3, 2, 0, 1))
    w2_oihw = jnp.transpose(P["w2g"], (0, 4, 3, 1, 2)).reshape(2 * C, -1, 3, 3)
    wfc1_oihw = jnp.transpose(P["wfc1g"], (0, 2, 1)).reshape(-1, P["wfc1g"].shape[1])[:, :, None, None]
    wfc2_oihw = jnp.transpose(P["wfc2g"], (0, 2, 1)).reshape(-1, P["wfc2g"].shape[1])[:, :, None, None]
    wd_oihw = jnp.transpose(P["wd"], (1, 0))[:, :, None, None]

    residual = bn(conv(x, wd_oihw, 0), P["bnd"])
    y = jax.nn.relu(bn(conv(x, w1_oihw, 1), P["bn1"]))
    xr = conv(y, w2_oihw, 1, groups=card * radix) + P["b2"][None, :, None, None]
    xr = jax.nn.relu(bn(xr, P["bn0s"]))
    sp0, sp1 = xr[:, :C], xr[:, C:]
    gap = jnp.mean(sp0 + sp1, axis=(2, 3), keepdims=True)
    g1 = conv(gap, wfc1_oihw, 0, groups=card) + P["bfc1"][None, :, None, None]
    g1 = jax.nn.relu(bn(g1, P["bn1s"]))
    a = conv(g1, wfc2_oihw, 0, groups=card) + P["bfc2"][None, :, None, None]
    B = x.shape[0]
    a = rsoftmax(a.reshape(B, 2 * C), radix, card)
    a0, a1 = a[:, :C], a[:, C:]
    out = jax.nn.relu(a0[:, :, None, None] * sp0 + a1[:, :, None, None] * sp1)
    return jax.nn.relu(out + residual)


# ----------------------------- main -----------------------------

if __name__ == "__main__":
    B, ch_in, ch_out, H, W = 2, 4, 8, 16, 16
    key = jax.random.PRNGKey(0)
    kx, kp = jax.random.split(key)
    x = jax.random.normal(kx, (B, ch_in, H, W), jnp.float32)
    P = init_params(kp, ch_in, ch_out)
    prep = prepare_params(P)                       # one-time weight/BN folding (hoisted)

    fwd = jax.jit(functools.partial(res_conv_block_forward, ch_out=ch_out))
    out = jax.block_until_ready(fwd(x, prep))
    assert out.shape == (B, ch_out, H, W), out.shape

    ref = reference_forward(x, P, ch_in, ch_out)
    # Kernels use default (fast) MXU precision with f32 accumulation; reference is HIGHEST,
    # so tolerance is loosened slightly per the perf review.
    if not jnp.allclose(out, ref, atol=2e-2, rtol=2e-2):
        raise SystemExit(f"mismatch: max abs err = {jnp.max(jnp.abs(out - ref))}")
    print("KERNEL_OK")
</pallas_src>

<mosaic_0001>
module attributes {stable_mosaic.version = 11 : i64} {
  func.func @_matmul_affine_kernel(%arg0: i32, %arg1: memref<256x36xf32, #tpu.memory_space<vmem>>, %arg2: memref<36x16xf32, #tpu.memory_space<vmem>>, %arg3: memref<1x16xf32, #tpu.memory_space<vmem>>, %arg4: memref<1x16xf32, #tpu.memory_space<vmem>>, %arg5: memref<1x16xf32, #tpu.memory_space<vmem>>, %arg6: memref<256x16xf32, #tpu.memory_space<vmem>>) attributes {dimension_semantics = [#tpu.dimension_semantics<parallel>], iteration_bounds = array<i64: 2>, scalar_prefetch = 0 : i64, scratch_operands = 0 : i64, tpu.core_type = #tpu.core_type<tc>, window_params = [{transform_indices = @transform_0, window_bounds = array<i64: 256, 36>}, {pipeline_mode = #tpu.pipeline_mode<synchronous>, transform_indices = @transform_1, window_bounds = array<i64: 36, 16>}, {pipeline_mode = #tpu.pipeline_mode<synchronous>, transform_indices = @transform_2, window_bounds = array<i64: 1, 16>}, {pipeline_mode = #tpu.pipeline_mode<synchronous>, transform_indices = @transform_3, window_bounds = array<i64: 1, 16>}, {pipeline_mode = #tpu.pipeline_mode<synchronous>, transform_indices = @transform_4, window_bounds = array<i64: 1, 16>}, {transform_indices = @transform_5, window_bounds = array<i64: 256, 16>}]} {
    %c0 = arith.constant 0 : index
    %c0_0 = arith.constant 0 : index
    %0 = vector.load %arg1[%c0, %c0_0] : memref<256x36xf32, #tpu.memory_space<vmem>>, vector<256x36xf32>
    %c0_1 = arith.constant 0 : index
    %c0_2 = arith.constant 0 : index
    %1 = vector.load %arg2[%c0_1, %c0_2] : memref<36x16xf32, #tpu.memory_space<vmem>>, vector<36x16xf32>
    %cst = arith.constant dense<0.000000e+00> : vector<256x16xf32>
    %2 = tpu.matmul %0, %1, %cst {dimension_numbers = #tpu.dot_dimension_numbers<[1], [0], [0], [1], [0, 0, 1, 1], [], []>} : vector<256x36xf32>, vector<36x16xf32>, vector<256x16xf32> -> vector<256x16xf32>
    %c0_3 = arith.constant 0 : index
    %c0_4 = arith.constant 0 : index
    %3 = vector.load %arg3[%c0_3, %c0_4] : memref<1x16xf32, #tpu.memory_space<vmem>>, vector<1x16xf32>
    %4 = vector.broadcast %3 : vector<1x16xf32> to vector<256x16xf32>
    %5 = arith.mulf %2, %4 : vector<256x16xf32>
    %c0_5 = arith.constant 0 : index
    %c0_6 = arith.constant 0 : index
    %6 = vector.load %arg4[%c0_5, %c0_6] : memref<1x16xf32, #tpu.memory_space<vmem>>, vector<1x16xf32>
    %7 = vector.broadcast %6 : vector<1x16xf32> to vector<256x16xf32>
    %8 = arith.addf %5, %7 : vector<256x16xf32>
    %c0_7 = arith.constant 0 : index
    %c0_8 = arith.constant 0 : index
    %9 = vector.load %arg5[%c0_7, %c0_8] : memref<1x16xf32, #tpu.memory_space<vmem>>, vector<1x16xf32>
    %cst_9 = arith.constant 0.000000e+00 : f32
    %10 = vector.broadcast %cst_9 : f32 to vector<1x16xf32>
    %11 = arith.cmpf ogt, %9, %10 : vector<1x16xf32>
    %cst_10 = arith.constant 0.000000e+00 : f32
    %12 = vector.broadcast %cst_10 : f32 to vector<256x16xf32>
    %13 = arith.maximumf %8, %12 : vector<256x16xf32>
    %14 = vector.shape_cast %11 : vector<1x16xi1> to vector<1x16xi1>
    %15 = vector.broadcast %14 : vector<1x16xi1> to vector<256x16xi1>
    %16 = arith.select %15, %13, %8 : vector<256x16xi1>, vector<256x16xf32>
    %c0_11 = arith.constant 0 : index
    %c0_12 = arith.constant 0 : index
    %17 = vector.load %arg6[%c0_11, %c0_12] : memref<256x16xf32, #tpu.memory_space<vmem>>, vector<256x16xf32>
    tpu.vector_store %arg6[%c0_11, %c0_12], %16 {strides = array<i32>} : memref<256x16xf32, #tpu.memory_space<vmem>>, vector<256x16xf32>,
    return
  }
  func.func @transform_0(%arg0: i32) -> (i32, i32) {
    %c0_i32 = arith.constant 0 : i32
    %c0_i32_0 = arith.constant 0 : i32
    return %arg0, %c0_i32 : i32, i32
  }
  func.func @transform_1(%arg0: i32) -> (i32, i32) {
    %c0_i32 = arith.constant 0 : i32
    %c0_i32_0 = arith.constant 0 : i32
    %c0_i32_1 = arith.constant 0 : i32
    return %c0_i32, %c0_i32_0 : i32, i32
  }
  func.func @transform_2(%arg0: i32) -> (i32, i32) {
    %c0_i32 = arith.constant 0 : i32
    %c0_i32_0 = arith.constant 0 : i32
    %c0_i32_1 = arith.constant 0 : i32
    return %c0_i32, %c0_i32_0 : i32, i32
  }
  func.func @transform_3(%arg0: i32) -> (i32, i32) {
    %c0_i32 = arith.constant 0 : i32
    %c0_i32_0 = arith.constant 0 : i32
    %c0_i32_1 = arith.constant 0 : i32
    return %c0_i32, %c0_i32_0 : i32, i32
  }
  func.func @transform_4(%arg0: i32) -> (i32, i32) {
    %c0_i32 = arith.constant 0 : i32
    %c0_i32_0 = arith.constant 0 : i32
    %c0_i32_1 = arith.constant 0 : i32
    return %c0_i32, %c0_i32_0 : i32, i32
  }
  func.func @transform_5(%arg0: i32) -> (i32, i32) {
    %c0_i32 = arith.constant 0 : i32
    %c0_i32_0 = arith.constant 0 : i32
    return %arg0, %c0_i32 : i32, i32
  }
}

module attributes {stable_mosaic.version = 11 : i64} {
  func.func @_matmul_affine_kernel(%arg0: i32, %arg1: memref<256x72xf32, #tpu.memory_space<vmem>>, %arg2: memref<72x16xf32, #tpu.memory_space<vmem>>, %arg3: memref<1x16xf32, #tpu.memory_space<vmem>>, %arg4: memref<1x16xf32, #tpu.memory_space<vmem>>, %arg5: memref<1x16xf32, #tpu.memory_space<vmem>>, %arg6: memref<256x16xf32, #tpu.memory_space<vmem>>) attributes {dimension_semantics = [#tpu.dimension_semantics<parallel>], iteration_bounds = array<i64: 2>, scalar_prefetch = 0 : i64, scratch_operands = 0 : i64, tpu.core_type = #tpu.core_type<tc>, window_params = [{transform_indices = @transform_0, window_bounds = array<i64: 256, 72>}, {pipeline_mode = #tpu.pipeline_mode<synchronous>, transform_indices = @transform_1, window_bounds = array<i64: 72, 16>}, {pipeline_mode = #tpu.pipeline_mode<synchronous>, transform_indices = @transform_2, window_bounds = array<i64: 1, 16>}, {pipeline_mode = #tpu.pipeline_mode<synchronous>, transform_indices = @transform_3, window_bounds = array<i64: 1, 16>}, {pipeline_mode = #tpu.pipeline_mode<synchronous>, transform_indices = @transform_4, window_bounds = array<i64: 1, 16>}, {transform_indices = @transform_5, window_bounds = array<i64: 256, 16>}]} {
    %c0 = arith.constant 0 : index
    %c0_0 = arith.constant 0 : index
    %0 = vector.load %arg1[%c0, %c0_0] : memref<256x72xf32, #tpu.memory_space<vmem>>, vector<256x72xf32>
    %c0_1 = arith.constant 0 : index
    %c0_2 = arith.constant 0 : index
    %1 = vector.load %arg2[%c0_1, %c0_2] : memref<72x16xf32, #tpu.memory_space<vmem>>, vector<72x16xf32>
    %cst = arith.constant dense<0.000000e+00> : vector<256x16xf32>
    %2 = tpu.matmul %0, %1, %cst {dimension_numbers = #tpu.dot_dimension_numbers<[1], [0], [0], [1], [0, 0, 1, 1], [], []>} : vector<256x72xf32>, vector<72x16xf32>, vector<256x16xf32> -> vector<256x16xf32>
    %c0_3 = arith.constant 0 : index
    %c0_4 = arith.constant 0 : index
    %3 = vector.load %arg3[%c0_3, %c0_4] : memref<1x16xf32, #tpu.memory_space<vmem>>, vector<1x16xf32>
    %4 = vector.broadcast %3 : vector<1x16xf32> to vector<256x16xf32>
    %5 = arith.mulf %2, %4 : vector<256x16xf32>
    %c0_5 = arith.constant 0 : index
    %c0_6 = arith.constant 0 : index
    %6 = vector.load %arg4[%c0_5, %c0_6] : memref<1x16xf32, #tpu.memory_space<vmem>>, vector<1x16xf32>
    %7 = vector.broadcast %6 : vector<1x16xf32> to vector<256x16xf32>
    %8 = arith.addf %5, %7 : vector<256x16xf32>
    %c0_7 = arith.constant 0 : index
    %c0_8 = arith.constant 0 : index
    %9 = vector.load %arg5[%c0_7, %c0_8] : memref<1x16xf32, #tpu.memory_space<vmem>>, vector<1x16xf32>
    %cst_9 = arith.constant 0.000000e+00 : f32
    %10 = vector.broadcast %cst_9 : f32 to vector<1x16xf32>
    %11 = arith.cmpf ogt, %9, %10 : vector<1x16xf32>
    %cst_10 = arith.constant 0.000000e+00 : f32
    %12 = vector.broadcast %cst_10 : f32 to vector<256x16xf32>
    %13 = arith.maximumf %8, %12 : vector<256x16xf32>
    %14 = vector.shape_cast %11 : vector<1x16xi1> to vector<1x16xi1>
    %15 = vector.broadcast %14 : vector<1x16xi1> to vector<256x16xi1>
    %16 = arith.select %15, %13, %8 : vector<256x16xi1>, vector<256x16xf32>
    %c0_11 = arith.constant 0 : index
    %c0_12 = arith.constant 0 : index
    %17 = vector.load %arg6[%c0_11, %c0_12] : memref<256x16xf32, #tpu.memory_space<vmem>>, vector<256x16xf32>
    tpu.vector_store %arg6[%c0_11, %c0_12], %16 {strides = array<i32>} : memref<256x16xf32, #tpu.memory_space<vmem>>, vector<256x16xf32>,
    return
  }
  func.func @transform_0(%arg0: i32) -> (i32, i32) {
    %c0_i32 = arith.constant 0 : i32
    %c0_i32_0 = arith.constant 0 : i32
    return %arg0, %c0_i32 : i32, i32
  }
  func.func @transform_1(%arg0: i32) -> (i32, i32) {
    %c0_i32 = arith.constant 0 : i32
    %c0_i32_0 = arith.constant 0 : i32
    %c0_i32_1 = arith.constant 0 : i32
    return %c0_i32, %c0_i32_0 : i32, i32
  }
  func.func @transform_2(%arg0: i32) -> (i32, i32) {
    %c0_i32 = arith.constant 0 : i32
    %c0_i32_0 = arith.constant 0 : i32
    %c0_i32_1 = arith.constant 0 : i32
    return %c0_i32, %c0_i32_0 : i32, i32
  }
  func.func @transform_3(%arg0: i32) -> (i32, i32) {
    %c0_i32 = arith.constant 0 : i32
    %c0_i32_0 = arith.constant 0 : i32
    %c0_i32_1 = arith.constant 0 : i32
    return %c0_i32, %c0_i32_0 : i32, i32
  }
  func.func @transform_4(%arg0: i32) -> (i32, i32) {
    %c0_i32 = arith.constant 0 : i32
    %c0_i32_0 = arith.constant 0 : i32
    %c0_i32_1 = arith.constant 0 : i32
    return %c0_i32, %c0_i32_0 : i32, i32
  }
  func.func @transform_5(%arg0: i32) -> (i32, i32) {
    %c0_i32 = arith.constant 0 : i32
    %c0_i32_0 = arith.constant 0 : i32
    return %arg0, %c0_i32 : i32, i32
  }
}

module attributes {stable_mosaic.version = 11 : i64} {
  func.func @_splat_residual_kernel(%arg0: i32, %arg1: memref<1x256x16xf32, #tpu.memory_space<vmem>>, %arg2: memref<1x1x16xf32, #tpu.memory_space<vmem>>, %arg3: memref<1x256x16xf32, #tpu.memory_space<vmem>>, %arg4: memref<1x256x8xf32, #tpu.memory_space<vmem>>) attributes {dimension_semantics = [#tpu.dimension_semantics<parallel>], iteration_bounds = array<i64: 2>, scalar_prefetch = 0 : i64, scratch_operands = 0 : i64, tpu.core_type = #tpu.core_type<tc>, window_params = [{transform_indices = @transform_0, window_bounds = array<i64: 1, 256, 16>}, {transform_indices = @transform_1, window_bounds = array<i64: 1, 1, 16>}, {transform_indices = @transform_2, window_bounds = array<i64: 1, 256, 16>}, {transform_indices = @transform_3, window_bounds = array<i64: 1, 256, 8>}]} {
    %c0 = arith.constant 0 : index
    %c0_0 = arith.constant 0 : index
    %c0_1 = arith.constant 0 : index
    %0 = vector.load %arg1[%c0, %c0_0, %c0_1] : memref<1x256x16xf32, #tpu.memory_space<vmem>>, vector<1x256x16xf32>
    %1 = vector.shape_cast %0 : vector<1x256x16xf32> to vector<256x16xf32>
    %c0_2 = arith.constant 0 : index
    %c0_3 = arith.constant 0 : index
    %c0_4 = arith.constant 0 : index
    %2 = vector.load %arg2[%c0_2, %c0_3, %c0_4] : memref<1x1x16xf32, #tpu.memory_space<vmem>>, vector<1x1x16xf32>
    %3 = vector.shape_cast %2 : vector<1x1x16xf32> to vector<1x16xf32>
    %4 = vector.broadcast %3 : vector<1x16xf32> to vector<256x16xf32>
    %5 = arith.mulf %1, %4 : vector<256x16xf32>
    %6 = vector.extract_strided_slice %5 {offsets = [0, 0], sizes = [256, 8], strides = [1, 1]} : vector<256x16xf32> to vector<256x8xf32>
    %7 = vector.extract_strided_slice %5 {offsets = [0, 8], sizes = [256, 8], strides = [1, 1]} : vector<256x16xf32> to vector<256x8xf32>
    %8 = arith.addf %6, %7 : vector<256x8xf32>
    %cst = arith.constant 0.000000e+00 : f32
    %9 = vector.broadcast %cst : f32 to vector<256x8xf32>
    %10 = arith.maximumf %8, %9 : vector<256x8xf32>
    %c0_5 = arith.constant 0 : index
    %c0_6 = arith.constant 0 : index
    %c0_7 = arith.constant 0 : index
    %11 = vector.load %arg3[%c0_5, %c0_6, %c0_7] : memref<1x256x16xf32, #tpu.memory_space<vmem>>, vector<1x256x16xf32>
    %12 = vector.shape_cast %11 : vector<1x256x16xf32> to vector<256x16xf32>
    %13 = vector.extract_strided_slice %12 {offsets = [0, 8], sizes = [256, 8], strides = [1, 1]} : vector<256x16xf32> to vector<256x8xf32>
    %14 = arith.addf %10, %13 : vector<256x8xf32>
    %cst_8 = arith.constant 0.000000e+00 : f32
    %15 = vector.broadcast %cst_8 : f32 to vector<256x8xf32>
    %16 = arith.maximumf %14, %15 : vector<256x8xf32>
    %c0_9 = arith.constant 0 : index
    %c0_10 = arith.constant 0 : index
    %c0_11 = arith.constant 0 : index
    %17 = vector.load %arg4[%c0_9, %c0_10, %c0_11] : memref<1x256x8xf32, #tpu.memory_space<vmem>>, vector<1x256x8xf32>
    %18 = vector.shape_cast %17 : vector<1x256x8xf32> to vector<256x8xf32>
    %19 = vector.shape_cast %16 : vector<256x8xf32> to vector<1x256x8xf32>
    tpu.vector_store %arg4[%c0_9, %c0_10, %c0_11], %19 {strides = array<i32>} : memref<1x256x8xf32, #tpu.memory_space<vmem>>, vector<1x256x8xf32>,
    return
  }
  func.func @transform_0(%arg0: i32) -> (i32, i32, i32) {
    %c0_i32 = arith.constant 0 : i32
    %c0_i32_0 = arith.constant 0 : i32
    %c0_i32_1 = arith.constant 0 : i32
    return %arg0, %c0_i32, %c0_i32_0 : i32, i32, i32
  }
  func.func @transform_1(%arg0: i32) -> (i32, i32, i32) {
    %c0_i32 = arith.constant 0 : i32
    %c0_i32_0 = arith.constant 0 : i32
    %c0_i32_1 = arith.constant 0 : i32
    return %arg0, %c0_i32, %c0_i32_0 : i32, i32, i32
  }
  func.func @transform_2(%arg0: i32) -> (i32, i32, i32) {
    %c0_i32 = arith.constant 0 : i32
    %c0_i32_0 = arith.constant 0 : i32
    %c0_i32_1 = arith.constant 0 : i32
    return %arg0, %c0_i32, %c0_i32_0 : i32, i32, i32
  }
  func.func @transform_3(%arg0: i32) -> (i32, i32, i32) {
    %c0_i32 = arith.constant 0 : i32
    %c0_i32_0 = arith.constant 0 : i32
    %c0_i32_1 = arith.constant 0 : i32
    return %arg0, %c0_i32, %c0_i32_0 : i32, i32, i32
  }
}

</mosaic_0001>

<bundles_post_ra>
// kernel: res_conv_block_forward.3
= control target key start
LH: loop header
LB: loop body
LE: loop exit
PB: predicated region body
PF: predicated region fallthrough
CT: control target
= control target key end

     0   :  { %s1029_s18 = smov 0   ;;  %s1344_s0 = inlined_call_operand.vmem [shape: f32[512,36], index: 0, kind: input, shape index: {}]   ;;  %s1345_s1 = inlined_call_operand.vmem [shape: f32[36,16], index: 1, kind: input, shape index: {}]   ;;  %s1346_s2 = inlined_call_operand.vmem [shape: f32[1,16], index: 2, kind: input, shape index: {}]   ;;  %s1347_s3 = inlined_call_operand.vmem [shape: f32[1,16], index: 3, kind: input, shape index: {}]   ;;  %s1348_s4 = inlined_call_operand.vmem [shape: f32[1,16], index: 4, kind: input, shape index: {}]   ;;  %s1349_s5 = inlined_call_operand.vmem [shape: f32[512,16], index: 5, kind: output, shape index: {}]  }
   0x1 LB: > { %s830_s19 = sadd.s32 4294967295, %s996_s18   ;;  %p834_p0 = scmp.ge.s32.totalorder %s996_s18, 1  ;;  %s996_s18 = sphi %s1029_s18, %s15_s18  }
   0x2   : > { %p188_p1 = scmp.lt.s32.totalorder %s996_s18, 3 }
   0x4   : > { %p189_p2 = pnand %p834_p0, %p188_p1 }
   0x5   : > { %s835_s24 = sshll.u32 (!%p189_p2), %s830_s19, 5 }
   0x6   : > { %192 = sbr.rel (%p189_p2) target bundleno = 257 (0x101), region = 40  ;;  %p217_p3 = scmp.lt.s32.totalorder (!%p189_p2), %s835_s24, 63 }
   0xb   : > { %v264_v0 = vld [vmem:[%s1345_s1 + $0x20] sm:$0xf]  ;;  %vm362_vm0 = vcmask 1043456   ;;  %v263_v1 = vld [vmem:[%s1345_s1 + $0x18] sm:$0xff]  ;;  %v262_v2 = vld [vmem:[%s1345_s1 + $0x10] sm:$0xff]  ;;  %s1351_s24 = smov (!%p217_p3, %s835_s24), 63  ;;  %v704_v37 = vlaneseq }
   0xc   : > { %913 = vmatprep.subr.msk.mxu0 %vm362_vm0, %v264_v0  ;;  %971 = vmatprep.subr.msk.mxu1 %vm362_vm0, %v264_v0  ;;  %v261_v3 = vld [vmem:[%s1345_s1 + $0x8] sm:$0xff]  ;;  %s836_s29 = sshll.u32 %s1351_s24, 3  ;;  %v260_v4 = vld [vmem:[%s1345_s1] sm:$0xff]  ;;  %vm265_vm1 = vcmask 293888   ;;  %v998_v41 = vmov 0   ;;  %vm741_vm4 = vcmask 130048  }
   0xd   : > { %914 = vmatpush3.msk.msra.mxu0 %vm362_vm0, %v264_v0  ;;  %976 = vmatpush3.msk.msra.mxu1 %vm362_vm0, %v264_v0  ;;  %s1060_s9 = scalar_lea.vmem %s1344_s0, %s836_s29  ;;  %v669_v38 = vld [vmem:[%s1348_s4] sm:$0x1]  ;;  %v705_v39 = vshrl.u32 %v704_v37, 7  ;;  %s1153_s19 = scalar_lea.vmem %s1349_s5, %s836_s29 }
   0xe   : > { %915 = vmatprep.subr.mxu0 %v263_v1  ;;  %972 = vmatprep.subr.mxu1 %v263_v1  ;;  %v228_v5 = vld [vmem:[%s1060_s9] sm:$0xff]  ;;  %v229_v7 = vld [vmem:[%s1060_s9 + $0x8] sm:$0xff]  ;;  %v230_v9 = vld [vmem:[%s1060_s9 + $0x10] sm:$0xff]  ;;  %vm670_vm2 = vcmp.gt.f32.partialorder %v669_v38, 0.0 }
   0xf   : > { %916 = vmatpush3.msra.mxu0 %v263_v1  ;;  %977 = vmatpush3.msra.mxu1 %v263_v1  ;;  %v244_v6 = vld [vmem:[%s1060_s9 + $0x80] sm:$0xff]  ;;  %v245_v8 = vld [vmem:[%s1060_s9 + $0x88] sm:$0xff]  ;;  %v246_v10 = vld [vmem:[%s1060_s9 + $0x90] sm:$0xff]  ;;  %v706_v40 = vsub.s32 0, %v705_v39  ;;  %v703_v42 = vsel %vm670_vm2, 1, %v998_v41 }
  0x10   : > { %917 = vmatprep.subr.mxu0 %v262_v2  ;;  %973 = vmatprep.subr.mxu1 %v262_v2  ;;  %v231_v11 = vld [vmem:[%s1060_s9 + $0x18] sm:$0xff]  ;;  %v232_v13 = vld [vmem:[%s1060_s9 + $0x20] sm:$0xff]  ;;  %v233_v15 = vld [vmem:[%s1060_s9 + $0x28] sm:$0xff] }
  0x11   : > { %918 = vmatpush3.msra.mxu0 %v262_v2  ;;  %978 = vmatpush3.msra.mxu1 %v262_v2  ;;  %v247_v12 = vld [vmem:[%s1060_s9 + $0x98] sm:$0xff]  ;;  %v248_v14 = vld [vmem:[%s1060_s9 + $0xa0] sm:$0xff]  ;;  %v249_v16 = vld [vmem:[%s1060_s9 + $0xa8] sm:$0xff]  ;;  %v1139_v46 = vrot.slane %v703_v42, %v706_v40 }
  0x12   : > { %919 = vmatprep.subr.mxu0 %v261_v3  ;;  %974 = vmatprep.subr.mxu1 %v261_v3  ;;  %v234_v17 = vld [vmem:[%s1060_s9 + $0x30] sm:$0xff]  ;;  %v235_v19 = vld [vmem:[%s1060_s9 + $0x38] sm:$0xff]  ;;  %v236_v21 = vld [vmem:[%s1060_s9 + $0x40] sm:$0xff] }
  0x13   : > { %920 = vmatpush3.msra.mxu0 %v261_v3  ;;  %979 = vmatpush3.msra.mxu1 %v261_v3  ;;  %v250_v18 = vld [vmem:[%s1060_s9 + $0xb0] sm:$0xff]  ;;  %v251_v20 = vld [vmem:[%s1060_s9 + $0xb8] sm:$0xff]  ;;  %v252_v22 = vld [vmem:[%s1060_s9 + $0xc0] sm:$0xff]  ;;  %vm708_vm3 = vcmp.eq.s32.totalorder %v1139_v46, 1 }
  0x14   : > { %921 = vmatprep.subr.mxu0 %v260_v4  ;;  %975 = vmatprep.subr.mxu1 %v260_v4  ;;  %v237_v23 = vld [vmem:[%s1060_s9 + $0x48] sm:$0xff]  ;;  %v238_v25 = vld [vmem:[%s1060_s9 + $0x50] sm:$0xff]  ;;  %v239_v27 = vld [vmem:[%s1060_s9 + $0x58] sm:$0xff] }
  0x15   : > { %922 = vmatpush3.msra.mxu0 %v260_v4  ;;  %980 = vmatpush3.msra.mxu1 %v260_v4  ;;  %v253_v24 = vld [vmem:[%s1060_s9 + $0xc8] sm:$0xff]  ;;  %v254_v26 = vld [vmem:[%s1060_s9 + $0xd0] sm:$0xff]  ;;  %v255_v28 = vld [vmem:[%s1060_s9 + $0xd8] sm:$0xff] }
  0x16   : > { %923 = vmatprep.mubr.msk.f32.mxu0 %vm265_vm1, %v228_v5  ;;  %947 = vmatprep.mubr.msk.f32.mxu1 %vm265_vm1, %v244_v6  ;;  %v240_v29 = vld [vmem:[%s1060_s9 + $0x60] sm:$0xff]  ;;  %v241_v31 = vld [vmem:[%s1060_s9 + $0x68] sm:$0xff]  ;;  %v242_v33 = vld [vmem:[%s1060_s9 + $0x70] sm:$0xff] }
  0x17   : > { %924 = vmatmul.mubr.msk.f32.vlgmr.msra.gmra.mxu0 %vm265_vm1, %v229_v7  ;;  %948 = vmatmul.mubr.msk.f32.vlgmr.msra.gmra.mxu1 %vm265_vm1, %v245_v8  ;;  %v256_v30 = vld [vmem:[%s1060_s9 + $0xe0] sm:$0xff]  ;;  %v257_v32 = vld [vmem:[%s1060_s9 + $0xe8] sm:$0xff]  ;;  %v258_v34 = vld [vmem:[%s1060_s9 + $0xf0] sm:$0xff] }
  0x18   : > { %926 = vmatprep.mubr.msk.f32.mxu0 %vm265_vm1, %v230_v9  ;;  %950 = vmatprep.mubr.msk.f32.mxu1 %vm265_vm1, %v246_v10  ;;  %v243_v35 = vld [vmem:[%s1060_s9 + $0x78] sm:$0xff]  ;;  %v1132_v43 = vld [vmem:[%s1346_s2] ss:$0 sm:$0xff] }
  0x19   : > { %v259_v36 = vld [vmem:[%s1060_s9 + $0xf8] sm:$0xff]  ;;  %v1137_v45 = vld [vmem:[%s1347_s3] ss:$0 sm:$0xff] }
  0x1b   : > { %927 = vmatmul.mubr.msk.f32.gmra.mxu0 %vm265_vm1, %v231_v11  ;;  %951 = vmatmul.mubr.msk.f32.gmra.mxu1 %vm265_vm1, %v247_v12 }
  0x1c   : > { %929 = vmatprep.mubr.msk.f32.mxu0 %vm265_vm1, %v232_v13  ;;  %953 = vmatprep.mubr.msk.f32.mxu1 %vm265_vm1, %v248_v14 }
  0x1f   : > { %930 = vmatmul.mubr.msk.f32.gmra.mxu0 %vm265_vm1, %v233_v15  ;;  %954 = vmatmul.mubr.msk.f32.gmra.mxu1 %vm265_vm1, %v249_v16 }
  0x20   : > { %932 = vmatprep.mubr.msk.f32.mxu0 %vm265_vm1, %v234_v17  ;;  %956 = vmatprep.mubr.msk.f32.mxu1 %vm265_vm1, %v250_v18 }
  0x23   : > { %933 = vmatmul.mubr.msk.f32.gmra.mxu0 %vm265_vm1, %v235_v19  ;;  %957 = vmatmul.mubr.msk.f32.gmra.mxu1 %vm265_vm1, %v251_v20 }
  0x24   : > { %935 = vmatprep.mubr.msk.f32.mxu0 %vm265_vm1, %v236_v21  ;;  %959 = vmatprep.mubr.msk.f32.mxu1 %vm265_vm1, %v252_v22 }
  0x27   : > { %936 = vmatmul.mubr.msk.f32.gmra.mxu0 %vm265_vm1, %v237_v23  ;;  %960 = vmatmul.mubr.msk.f32.gmra.mxu1 %vm265_vm1, %v253_v24 }
  0x28   : > { %938 = vmatprep.mubr.msk.f32.mxu0 %vm265_vm1, %v238_v25  ;;  %962 = vmatprep.mubr.msk.f32.mxu1 %vm265_vm1, %v254_v26 }
  0x2b   : > { %939 = vmatmul.mubr.msk.f32.gmra.mxu0 %vm265_vm1, %v239_v27  ;;  %963 = vmatmul.mubr.msk.f32.gmra.mxu1 %vm265_vm1, %v255_v28 }
  0x2c   : > { %941 = vmatprep.mubr.msk.f32.mxu0 %vm265_vm1, %v240_v29  ;;  %965 = vmatprep.mubr.msk.f32.mxu1 %vm265_vm1, %v256_v30 }
  0x2f   : > { %942 = vmatmul.mubr.msk.f32.gmra.mxu0 %vm265_vm1, %v241_v31  ;;  %966 = vmatmul.mubr.msk.f32.gmra.mxu1 %vm265_vm1, %v257_v32 }
  0x30   : > { %944 = vmatprep.mubr.msk.f32.mxu0 %vm265_vm1, %v242_v33  ;;  %968 = vmatprep.mubr.msk.f32.mxu1 %vm265_vm1, %v258_v34 }
  0x33   : > { %945 = vmatmul.mubr.msk.f32.gmra.mxu0 %vm265_vm1, %v243_v35  ;;  %969 = vmatmul.mubr.msk.f32.gmra.mxu1 %vm265_vm1, %v259_v36 }
  0xd7   : > { %v925_v44 = vpop.f32.mrf.mxu0  ;;  %v949_v47 = vpop.f32.mrf.mxu1 }
  0xd8   : > { %v599_v48 = vmul.f32 %v925_v44, %v1132_v43  ;;  %v615_v49 = vmul.f32 %v949_v47, %v1132_v43 }
  0xd9   : > { %v432_v50 = vpop.f32.mrf.mxu0  ;;  %v512_v51 = vpop.f32.mrf.mxu1 }
  0xda   : > { %v638_v52 = vadd.f32 %v1137_v45, %v599_v48  ;;  %v654_v53 = vadd.f32 %v1137_v45, %v615_v49  ;;  %v598_v54 = vmul.f32 %v1132_v43, %v432_v50  ;;  %v614_v55 = vmul.f32 %v1132_v43, %v512_v51 }
  0xdb   : > { %v928_v56 = vpop.f32.mrf.mxu0  ;;  %v952_v57 = vpop.f32.mrf.mxu1 }
  0xdc   : > { %v672_v58 = vmax.f32 %v638_v52, 0.0  ;;  %v688_v59 = vmax.f32 %v654_v53, 0.0  ;;  %v637_v60 = vadd.f32 %v1137_v45, %v598_v54  ;;  %v653_v61 = vadd.f32 %v1137_v45, %v614_v55 }
  0xdd   : > { %v601_v62 = vmul.f32 %v928_v56, %v1132_v43  ;;  %v617_v63 = vmul.f32 %v952_v57, %v1132_v43  ;;  %v442_v0 = vpop.f32.mrf.mxu0  ;;  %v522_v1 = vpop.f32.mrf.mxu1 }
  0xde   : > { %v710_v2 = vsel %vm708_vm3, %v672_v58, %v638_v52  ;;  %v726_v3 = vsel %vm708_vm3, %v688_v59, %v654_v53  ;;  %v671_v4 = vmax.f32 %v637_v60, 0.0  ;;  %v687_v5 = vmax.f32 %v653_v61, 0.0 }
  0xdf   : > { %743 = vst.msk [vmem:[%s1153_s19 + $0x8] sm:$0xff] %vm741_vm4, %v710_v2  ;;  %759 = vst.msk [vmem:[%s1153_s19 + $0x88] sm:$0xff] %vm741_vm4, %v726_v3  ;;  %v640_v6 = vadd.f32 %v1137_v45, %v601_v62  ;;  %v656_v7 = vadd.f32 %v1137_v45, %v617_v63  ;;  %v600_v8 = vmul.f32 %v1132_v43, %v442_v0  ;;  %v931_v10 = vpop.f32.mrf.mxu0  ;;  %v955_v11 = vpop.f32.mrf.mxu1 }
  0xe0   : > { %v616_v9 = vmul.f32 %v1132_v43, %v522_v1  ;;  %v709_v12 = vsel %vm708_vm3, %v671_v4, %v637_v60  ;;  %v725_v13 = vsel %vm708_vm3, %v687_v5, %v653_v61  ;;  %v603_v14 = vmul.f32 %v931_v10, %v1132_v43 }
  0xe1   : > { %v619_v15 = vmul.f32 %v955_v11, %v1132_v43  ;;  %742 = vst.msk [vmem:[%s1153_s19] sm:$0xff] %vm741_vm4, %v709_v12  ;;  %758 = vst.msk [vmem:[%s1153_s19 + $0x80] sm:$0xff] %vm741_vm4, %v725_v13  ;;  %v674_v16 = vmax.f32 %v640_v6, 0.0  ;;  %v690_v17 = vmax.f32 %v656_v7, 0.0  ;;  %v639_v18 = vadd.f32 %v1137_v45, %v600_v8  ;;  %v452_v20 = vpop.f32.mrf.mxu0  ;;  %v532_v21 = vpop.f32.mrf.mxu1 }
  0xe2   : > { %v655_v19 = vadd.f32 %v1137_v45, %v616_v9  ;;  %v642_v22 = vadd.f32 %v1137_v45, %v603_v14  ;;  %v602_v24 = vmul.f32 %v1132_v43, %v452_v20  ;;  %v618_v25 = vmul.f32 %v1132_v43, %v532_v21 }
  0xe3   : > { %v658_v23 = vadd.f32 %v1137_v45, %v619_v15  ;;  %v712_v26 = vsel %vm708_vm3, %v674_v16, %v640_v6  ;;  %v728_v27 = vsel %vm708_vm3, %v690_v17, %v656_v7  ;;  %v673_v28 = vmax.f32 %v639_v18, 0.0  ;;  %v934_v30 = vpop.f32.mrf.mxu0  ;;  %v958_v31 = vpop.f32.mrf.mxu1 }
  0xe4   : > { %v689_v29 = vmax.f32 %v655_v19, 0.0  ;;  %745 = vst.msk [vmem:[%s1153_s19 + $0x18] sm:$0xff] %vm741_vm4, %v712_v26  ;;  %761 = vst.msk [vmem:[%s1153_s19 + $0x98] sm:$0xff] %vm741_vm4, %v728_v27  ;;  %v676_v32 = vmax.f32 %v642_v22, 0.0  ;;  %v641_v34 = vadd.f32 %v1137_v45, %v602_v24  ;;  %v657_v35 = vadd.f32 %v1137_v45, %v618_v25 }
  0xe5   : > { %v692_v33 = vmax.f32 %v658_v23, 0.0  ;;  %v711_v36 = vsel %vm708_vm3, %v673_v28, %v639_v18  ;;  %v605_v38 = vmul.f32 %v934_v30, %v1132_v43  ;;  %v621_v39 = vmul.f32 %v958_v31, %v1132_v43  ;;  %v462_v40 = vpop.f32.mrf.mxu0  ;;  %v542_v41 = vpop.f32.mrf.mxu1 }
  0xe6   : > { %v727_v37 = vsel %vm708_vm3, %v689_v29, %v655_v19  ;;  %744 = vst.msk [vmem:[%s1153_s19 + $0x10] sm:$0xff] %vm741_vm4, %v711_v36  ;;  %v714_v42 = vsel %vm708_vm3, %v676_v32, %v642_v22  ;;  %v675_v47 = vmax.f32 %v641_v34, 0.0  ;;  %v691_v48 = vmax.f32 %v657_v35, 0.0 }
  0xe7   : > { %760 = vst.msk [vmem:[%s1153_s19 + $0x90] sm:$0xff] %vm741_vm4, %v727_v37  ;;  %v730_v44 = vsel %vm708_vm3, %v692_v33, %v658_v23  ;;  %747 = vst.msk [vmem:[%s1153_s19 + $0x28] sm:$0xff] %vm741_vm4, %v714_v42  ;;  %v644_v49 = vadd.f32 %v1137_v45, %v605_v38  ;;  %v660_v50 = vadd.f32 %v1137_v45, %v621_v39  ;;  %v937_v53 = vpop.f32.mrf.mxu0  ;;  %v961_v54 = vpop.f32.mrf.mxu1 }
  0xe8   : > { %763 = vst.msk [vmem:[%s1153_s19 + $0xa8] sm:$0xff] %vm741_vm4, %v730_v44  ;;  %v604_v51 = vmul.f32 %v1132_v43, %v462_v40  ;;  %v620_v52 = vmul.f32 %v1132_v43, %v542_v41  ;;  %v713_v55 = vsel %vm708_vm3, %v675_v47, %v641_v34  ;;  %v729_v56 = vsel %vm708_vm3, %v691_v48, %v657_v35 }
  0xe9   : > { %v607_v57 = vmul.f32 %v937_v53, %v1132_v43  ;;  %v623_v58 = vmul.f32 %v961_v54, %v1132_v43  ;;  %746 = vst.msk [vmem:[%s1153_s19 + $0x20] sm:$0xff] %vm741_vm4, %v713_v55  ;;  %762 = vst.msk [vmem:[%s1153_s19 + $0xa0] sm:$0xff] %vm741_vm4, %v729_v56  ;;  %v678_v59 = vmax.f32 %v644_v49, 0.0  ;;  %v694_v60 = vmax.f32 %v660_v50, 0.0  ;;  %v472_v63 = vpop.f32.mrf.mxu0  ;;  %v552_v0 = vpop.f32.mrf.mxu1 }
  0xea   : > { %v643_v61 = vadd.f32 %v1137_v45, %v604_v51  ;;  %v659_v62 = vadd.f32 %v1137_v45, %v620_v52  ;;  %v606_v3 = vmul.f32 %v1132_v43, %v472_v63  ;;  %v622_v4 = vmul.f32 %v1132_v43, %v552_v0 }
  0xeb   : > { %v646_v1 = vadd.f32 %v1137_v45, %v607_v57  ;;  %v662_v2 = vadd.f32 %v1137_v45, %v623_v58  ;;  %v716_v5 = vsel %vm708_vm3, %v678_v59, %v644_v49  ;;  %v732_v6 = vsel %vm708_vm3, %v694_v60, %v660_v50  ;;  %v940_v9 = vpop.f32.mrf.mxu0  ;;  %v964_v10 = vpop.f32.mrf.mxu1 }
  0xec   : > { %v677_v7 = vmax.f32 %v643_v61, 0.0  ;;  %v693_v8 = vmax.f32 %v659_v62, 0.0  ;;  %749 = vst.msk [vmem:[%s1153_s19 + $0x38] sm:$0xff] %vm741_vm4, %v716_v5  ;;  %765 = vst.msk [vmem:[%s1153_s19 + $0xb8] sm:$0xff] %vm741_vm4, %v732_v6  ;;  %v645_v13 = vadd.f32 %v1137_v45, %v606_v3  ;;  %v661_v14 = vadd.f32 %v1137_v45, %v622_v4 }
  0xed   : > { %v680_v11 = vmax.f32 %v646_v1, 0.0  ;;  %v696_v12 = vmax.f32 %v662_v2, 0.0  ;;  %v609_v17 = vmul.f32 %v940_v9, %v1132_v43  ;;  %v625_v18 = vmul.f32 %v964_v10, %v1132_v43  ;;  %v482_v19 = vpop.f32.mrf.mxu0  ;;  %v562_v20 = vpop.f32.mrf.mxu1 }
  0xee   : > { %v715_v15 = vsel %vm708_vm3, %v677_v7, %v643_v61  ;;  %v731_v16 = vsel %vm708_vm3, %v693_v8, %v659_v62  ;;  %v679_v23 = vmax.f32 %v645_v13, 0.0  ;;  %v695_v24 = vmax.f32 %v661_v14, 0.0 }
  0xef   : > { %748 = vst.msk [vmem:[%s1153_s19 + $0x30] sm:$0xff] %vm741_vm4, %v715_v15  ;;  %764 = vst.msk [vmem:[%s1153_s19 + $0xb0] sm:$0xff] %vm741_vm4, %v731_v16  ;;  %v718_v21 = vsel %vm708_vm3, %v680_v11, %v646_v1  ;;  %v734_v22 = vsel %vm708_vm3, %v696_v12, %v662_v2  ;;  %v648_v25 = vadd.f32 %v1137_v45, %v609_v17  ;;  %v943_v29 = vpop.f32.mrf.mxu0  ;;  %v967_v30 = vpop.f32.mrf.mxu1 }
  0xf0   : > { %751 = vst.msk [vmem:[%s1153_s19 + $0x48] sm:$0xff] %vm741_vm4, %v718_v21  ;;  %767 = vst.msk [vmem:[%s1153_s19 + $0xc8] sm:$0xff] %vm741_vm4, %v734_v22  ;;  %v664_v26 = vadd.f32 %v1137_v45, %v625_v18  ;;  %v608_v27 = vmul.f32 %v1132_v43, %v482_v19  ;;  %v624_v28 = vmul.f32 %v1132_v43, %v562_v20 }
  0xf1   : > { %v717_v31 = vsel %vm708_vm3, %v679_v23, %v645_v13  ;;  %v733_v32 = vsel %vm708_vm3, %v695_v24, %v661_v14  ;;  %v611_v33 = vmul.f32 %v943_v29, %v1132_v43  ;;  %v627_v34 = vmul.f32 %v967_v30, %v1132_v43  ;;  %v492_v39 = vpop.f32.mrf.mxu0  ;;  %v572_v40 = vpop.f32.mrf.mxu1 }
  0xf2   : > { %750 = vst.msk [vmem:[%s1153_s19 + $0x40] sm:$0xff] %vm741_vm4, %v717_v31  ;;  %766 = vst.msk [vmem:[%s1153_s19 + $0xc0] sm:$0xff] %vm741_vm4, %v733_v32  ;;  %v682_v35 = vmax.f32 %v648_v25, 0.0  ;;  %v698_v36 = vmax.f32 %v664_v26, 0.0  ;;  %v647_v37 = vadd.f32 %v1137_v45, %v608_v27  ;;  %v663_v38 = vadd.f32 %v1137_v45, %v624_v28 }
  0xf3   : > { %v650_v41 = vadd.f32 %v1137_v45, %v611_v33  ;;  %v666_v42 = vadd.f32 %v1137_v45, %v627_v34  ;;  %v610_v44 = vmul.f32 %v1132_v43, %v492_v39  ;;  %v626_v47 = vmul.f32 %v1132_v43, %v572_v40  ;;  %v946_v52 = vpop.f32.mrf.mxu0  ;;  %v970_v53 = vpop.f32.mrf.mxu1 }
  0xf4   : > { %v720_v48 = vsel %vm708_vm3, %v682_v35, %v648_v25  ;;  %v736_v49 = vsel %vm708_vm3, %v698_v36, %v664_v26  ;;  %v681_v50 = vmax.f32 %v647_v37, 0.0  ;;  %v697_v51 = vmax.f32 %v663_v38, 0.0 }
  0xf5   : > { %753 = vst.msk [vmem:[%s1153_s19 + $0x58] sm:$0xff] %vm741_vm4, %v720_v48  ;;  %769 = vst.msk [vmem:[%s1153_s19 + $0xd8] sm:$0xff] %vm741_vm4, %v736_v49  ;;  %v684_v54 = vmax.f32 %v650_v41, 0.0  ;;  %v700_v55 = vmax.f32 %v666_v42, 0.0  ;;  %v649_v56 = vadd.f32 %v1137_v45, %v610_v44  ;;  %v665_v57 = vadd.f32 %v1137_v45, %v626_v47  ;;  %v502_v62 = vpop.f32.mrf.mxu0  ;;  %v582_v63 = vpop.f32.mrf.mxu1 }
  0xf6   : > { %v719_v58 = vsel %vm708_vm3, %v681_v50, %v647_v37  ;;  %v735_v59 = vsel %vm708_vm3, %v697_v51, %v663_v38  ;;  %v613_v60 = vmul.f32 %v946_v52, %v1132_v43  ;;  %v629_v61 = vmul.f32 %v970_v53, %v1132_v43 }
  0xf7   : > { %752 = vst.msk [vmem:[%s1153_s19 + $0x50] sm:$0xff] %vm741_vm4, %v719_v58  ;;  %768 = vst.msk [vmem:[%s1153_s19 + $0xd0] sm:$0xff] %vm741_vm4, %v735_v59  ;;  %v722_v0 = vsel %vm708_vm3, %v684_v54, %v650_v41  ;;  %v738_v1 = vsel %vm708_vm3, %v700_v55, %v666_v42  ;;  %v683_v2 = vmax.f32 %v649_v56, 0.0  ;;  %v699_v3 = vmax.f32 %v665_v57, 0.0 }
  0xf8   : > { %755 = vst.msk [vmem:[%s1153_s19 + $0x68] sm:$0xff] %vm741_vm4, %v722_v0  ;;  %771 = vst.msk [vmem:[%s1153_s19 + $0xe8] sm:$0xff] %vm741_vm4, %v738_v1  ;;  %v652_v4 = vadd.f32 %v1137_v45, %v613_v60  ;;  %v668_v5 = vadd.f32 %v1137_v45, %v629_v61  ;;  %v612_v6 = vmul.f32 %v1132_v43, %v502_v62 }
  0xf9   : > { %v628_v7 = vmul.f32 %v1132_v43, %v582_v63  ;;  %v721_v8 = vsel %vm708_vm3, %v683_v2, %v649_v56  ;;  %v737_v9 = vsel %vm708_vm3, %v699_v3, %v665_v57 }
  0xfa   : > { %754 = vst.msk [vmem:[%s1153_s19 + $0x60] sm:$0xff] %vm741_vm4, %v721_v8  ;;  %770 = vst.msk [vmem:[%s1153_s19 + $0xe0] sm:$0xff] %vm741_vm4, %v737_v9  ;;  %v686_v10 = vmax.f32 %v652_v4, 0.0  ;;  %v702_v11 = vmax.f32 %v668_v5, 0.0  ;;  %v651_v12 = vadd.f32 %v1137_v45, %v612_v6 }
  0xfb   : > { %v667_v13 = vadd.f32 %v1137_v45, %v628_v7 }
  0xfc   : > { %v724_v43 = vsel %vm708_vm3, %v686_v10, %v652_v4  ;;  %v740_v14 = vsel %vm708_vm3, %v702_v11, %v668_v5  ;;  %v685_v15 = vmax.f32 %v651_v12, 0.0 }
  0xfd   : > { %v701_v16 = vmax.f32 %v667_v13, 0.0  ;;  %757 = vst.msk [vmem:[%s1153_s19 + $0x78] sm:$0xff] %vm741_vm4, %v724_v43  ;;  %773 = vst.msk [vmem:[%s1153_s19 + $0xf8] sm:$0xff] %vm741_vm4, %v740_v14 }
  0xfe   : > { %v723_v17 = vsel %vm708_vm3, %v685_v15, %v651_v12 }
  0xff   : > { %v739_v18 = vsel %vm708_vm3, %v701_v16, %v667_v13  ;;  %756 = vst.msk [vmem:[%s1153_s19 + $0x70] sm:$0xff] %vm741_vm4, %v723_v17 }
 0x100   : > { %772 = vst.msk [vmem:[%s1153_s19 + $0xf0] sm:$0xff] %vm741_vm4, %v739_v18 }
 0x101 PF: > { %s15_s18 = sadd.s32 1, %s996_s18  }
 0x102   : > { %p12_p4 = scmp.ge.s32.totalorder %s15_s18, 4  }
 0x104   :  { %14 = sbr.rel (!%p12_p4) target bundleno = 1 (0x1), region = 70 }

// kernel: res_conv_block_forward.4
= control target key start
LH: loop header
LB: loop body
LE: loop exit
PB: predicated region body
PF: predicated region fallthrough
CT: control target
= control target key end

     0   :  { %s1048_s18 = smov 0   ;;  %s1375_s0 = inlined_call_operand.vmem [shape: f32[512,72], index: 0, kind: input, shape index: {}]   ;;  %s1376_s1 = inlined_call_operand.vmem [shape: f32[72,16], index: 1, kind: input, shape index: {}]   ;;  %s1377_s2 = inlined_call_operand.vmem [shape: f32[1,16], index: 2, kind: input, shape index: {}]   ;;  %s1378_s3 = inlined_call_operand.vmem [shape: f32[1,16], index: 3, kind: input, shape index: {}]   ;;  %s1379_s4 = inlined_call_operand.vmem [shape: f32[1,16], index: 4, kind: input, shape index: {}]   ;;  %s1380_s5 = inlined_call_operand.vmem [shape: f32[512,16], index: 5, kind: output, shape index: {}]  }
   0x1 LB: > { %s830_s19 = sadd.s32 4294967295, %s1015_s18   ;;  %p834_p0 = scmp.ge.s32.totalorder %s1015_s18, 1  ;;  %s1015_s18 = sphi %s1048_s18, %s15_s18  }
   0x2   : > { %p188_p1 = scmp.lt.s32.totalorder %s1015_s18, 3 }
   0x4   : > { %p189_p2 = pnand %p834_p0, %p188_p1 }
   0x5   : > { %s835_s24 = sshll.u32 (!%p189_p2), %s830_s19, 5 }
   0x6   : > { %192 = sbr.rel (%p189_p2) target bundleno = 265 (0x109), region = 40  ;;  %p217_p3 = scmp.lt.s32.totalorder (!%p189_p2), %s835_s24, 63 }
   0xb   : > { %v268_v0 = vld [vmem:[%s1376_s1 + $0x40] sm:$0xff]  ;;  %v267_v1 = vld [vmem:[%s1376_s1 + $0x38] sm:$0xff]  ;;  %v266_v2 = vld [vmem:[%s1376_s1 + $0x30] sm:$0xff]  ;;  %s1382_s24 = smov (!%p217_p3, %s835_s24), 63  ;;  %vm269_vm0 = vcmask 588800   ;;  %v704_v41 = vlaneseq  ;;  %v1017_v45 = vmov 0  }
   0xc   : > { %916 = vmatprep.subr.mxu0 %v268_v0  ;;  %982 = vmatprep.subr.mxu1 %v268_v0  ;;  %v265_v3 = vld [vmem:[%s1376_s1 + $0x28] sm:$0xff]  ;;  %v264_v4 = vld [vmem:[%s1376_s1 + $0x20] sm:$0xff]  ;;  %v263_v5 = vld [vmem:[%s1376_s1 + $0x18] sm:$0xff]  ;;  %s836_s10 = sshll.u32 %s1382_s24, 3  ;;  %vm741_vm3 = vcmask 130048  }
   0xd   : > { %917 = vmatpush3.msra.mxu0 %v268_v0  ;;  %991 = vmatpush3.msra.mxu1 %v268_v0  ;;  %v262_v6 = vld [vmem:[%s1376_s1 + $0x10] sm:$0xff]  ;;  %v261_v7 = vld [vmem:[%s1376_s1 + $0x8] sm:$0xff]  ;;  %s1088_s15 = scalar_lea.vmem %s1375_s0, %s836_s10  ;;  %v260_v8 = vld [vmem:[%s1376_s1] sm:$0xff]  ;;  %v705_v43 = vshrl.u32 %v704_v41, 7  ;;  %s1184_s28 = scalar_lea.vmem %s1380_s5, %s836_s10 }
   0xe   : > { %918 = vmatprep.subr.mxu0 %v267_v1  ;;  %983 = vmatprep.subr.mxu1 %v267_v1  ;;  %v228_v9 = vld [vmem:[%s1088_s15] sm:$0xff]  ;;  %v229_v11 = vld [vmem:[%s1088_s15 + $0x8] sm:$0xff]  ;;  %v230_v13 = vld [vmem:[%s1088_s15 + $0x10] sm:$0xff] }
   0xf   : > { %919 = vmatpush3.msra.mxu0 %v267_v1  ;;  %992 = vmatpush3.msra.mxu1 %v267_v1  ;;  %v244_v10 = vld [vmem:[%s1088_s15 + $0x80] sm:$0xff]  ;;  %v245_v12 = vld [vmem:[%s1088_s15 + $0x88] sm:$0xff]  ;;  %v246_v14 = vld [vmem:[%s1088_s15 + $0x90] sm:$0xff]  ;;  %v706_v44 = vsub.s32 0, %v705_v43 }
  0x10   : > { %920 = vmatprep.subr.mxu0 %v266_v2  ;;  %984 = vmatprep.subr.mxu1 %v266_v2  ;;  %v231_v15 = vld [vmem:[%s1088_s15 + $0x18] sm:$0xff]  ;;  %v232_v17 = vld [vmem:[%s1088_s15 + $0x20] sm:$0xff]  ;;  %v233_v19 = vld [vmem:[%s1088_s15 + $0x28] sm:$0xff] }
  0x11   : > { %921 = vmatpush3.msra.mxu0 %v266_v2  ;;  %993 = vmatpush3.msra.mxu1 %v266_v2  ;;  %v247_v16 = vld [vmem:[%s1088_s15 + $0x98] sm:$0xff]  ;;  %v248_v18 = vld [vmem:[%s1088_s15 + $0xa0] sm:$0xff]  ;;  %v249_v20 = vld [vmem:[%s1088_s15 + $0xa8] sm:$0xff] }
  0x12   : > { %922 = vmatprep.subr.mxu0 %v265_v3  ;;  %985 = vmatprep.subr.mxu1 %v265_v3  ;;  %v234_v21 = vld [vmem:[%s1088_s15 + $0x30] sm:$0xff]  ;;  %v235_v23 = vld [vmem:[%s1088_s15 + $0x38] sm:$0xff]  ;;  %v236_v25 = vld [vmem:[%s1088_s15 + $0x40] sm:$0xff] }
  0x13   : > { %923 = vmatpush3.msra.mxu0 %v265_v3  ;;  %994 = vmatpush3.msra.mxu1 %v265_v3  ;;  %v250_v22 = vld [vmem:[%s1088_s15 + $0xb0] sm:$0xff]  ;;  %v251_v24 = vld [vmem:[%s1088_s15 + $0xb8] sm:$0xff]  ;;  %v252_v26 = vld [vmem:[%s1088_s15 + $0xc0] sm:$0xff] }
  0x14   : > { %924 = vmatprep.subr.mxu0 %v264_v4  ;;  %986 = vmatprep.subr.mxu1 %v264_v4  ;;  %v237_v27 = vld [vmem:[%s1088_s15 + $0x48] sm:$0xff]  ;;  %v238_v29 = vld [vmem:[%s1088_s15 + $0x50] sm:$0xff]  ;;  %v239_v31 = vld [vmem:[%s1088_s15 + $0x58] sm:$0xff] }
  0x15   : > { %925 = vmatpush3.msra.mxu0 %v264_v4  ;;  %995 = vmatpush3.msra.mxu1 %v264_v4  ;;  %v253_v28 = vld [vmem:[%s1088_s15 + $0xc8] sm:$0xff]  ;;  %v254_v30 = vld [vmem:[%s1088_s15 + $0xd0] sm:$0xff]  ;;  %v255_v32 = vld [vmem:[%s1088_s15 + $0xd8] sm:$0xff] }
  0x16   : > { %926 = vmatprep.subr.mxu0 %v263_v5  ;;  %987 = vmatprep.subr.mxu1 %v263_v5  ;;  %v240_v33 = vld [vmem:[%s1088_s15 + $0x60] sm:$0xff]  ;;  %v241_v35 = vld [vmem:[%s1088_s15 + $0x68] sm:$0xff]  ;;  %v242_v37 = vld [vmem:[%s1088_s15 + $0x70] sm:$0xff] }
  0x17   : > { %927 = vmatpush3.msra.mxu0 %v263_v5  ;;  %996 = vmatpush3.msra.mxu1 %v263_v5  ;;  %v256_v34 = vld [vmem:[%s1088_s15 + $0xe0] sm:$0xff]  ;;  %v257_v36 = vld [vmem:[%s1088_s15 + $0xe8] sm:$0xff]  ;;  %v258_v38 = vld [vmem:[%s1088_s15 + $0xf0] sm:$0xff] }
  0x18   : > { %928 = vmatprep.subr.mxu0 %v262_v6  ;;  %988 = vmatprep.subr.mxu1 %v262_v6  ;;  %v243_v39 = vld [vmem:[%s1088_s15 + $0x78] sm:$0xff]  ;;  %v669_v42 = vld [vmem:[%s1379_s4] sm:$0x1] }
  0x19   : > { %929 = vmatpush3.msra.mxu0 %v262_v6  ;;  %997 = vmatpush3.msra.mxu1 %v262_v6  ;;  %v259_v40 = vld [vmem:[%s1088_s15 + $0xf8] sm:$0xff]  ;;  %vm670_vm1 = vcmp.gt.f32.partialorder %v669_v42, 0.0  ;;  %v1163_v47 = vld [vmem:[%s1377_s2] ss:$0 sm:$0xff] }
  0x1a   : > { %930 = vmatprep.subr.mxu0 %v261_v7  ;;  %989 = vmatprep.subr.mxu1 %v261_v7  ;;  %v703_v46 = vsel %vm670_vm1, 1, %v1017_v45  ;;  %v1168_v49 = vld [vmem:[%s1378_s3] ss:$0 sm:$0xff] }
  0x1b   : > { %931 = vmatpush3.msra.mxu0 %v261_v7  ;;  %998 = vmatpush3.msra.mxu1 %v261_v7  ;;  %v1170_v50 = vrot.slane %v703_v46, %v706_v44 }
  0x1c   : > { %932 = vmatprep.subr.mxu0 %v260_v8  ;;  %990 = vmatprep.subr.mxu1 %v260_v8 }
  0x1d   : > { %933 = vmatpush3.msra.mxu0 %v260_v8  ;;  %999 = vmatpush3.msra.mxu1 %v260_v8  ;;  %vm708_vm2 = vcmp.eq.s32.totalorder %v1170_v50, 1 }
  0x1e   : > { %934 = vmatprep.mubr.msk.f32.mxu0 %vm269_vm0, %v228_v9  ;;  %958 = vmatprep.mubr.msk.f32.mxu1 %vm269_vm0, %v244_v10 }
  0x1f   : > { %935 = vmatmul.mubr.msk.f32.vlgmr.msra.gmra.mxu0 %vm269_vm0, %v229_v11  ;;  %959 = vmatmul.mubr.msk.f32.vlgmr.msra.gmra.mxu1 %vm269_vm0, %v245_v12 }
  0x20   : > { %937 = vmatprep.mubr.msk.f32.mxu0 %vm269_vm0, %v230_v13  ;;  %961 = vmatprep.mubr.msk.f32.mxu1 %vm269_vm0, %v246_v14 }
  0x23   : > { %938 = vmatmul.mubr.msk.f32.gmra.mxu0 %vm269_vm0, %v231_v15  ;;  %962 = vmatmul.mubr.msk.f32.gmra.mxu1 %vm269_vm0, %v247_v16 }
  0x24   : > { %940 = vmatprep.mubr.msk.f32.mxu0 %vm269_vm0, %v232_v17  ;;  %964 = vmatprep.mubr.msk.f32.mxu1 %vm269_vm0, %v248_v18 }
  0x27   : > { %941 = vmatmul.mubr.msk.f32.gmra.mxu0 %vm269_vm0, %v233_v19  ;;  %965 = vmatmul.mubr.msk.f32.gmra.mxu1 %vm269_vm0, %v249_v20 }
  0x28   : > { %943 = vmatprep.mubr.msk.f32.mxu0 %vm269_vm0, %v234_v21  ;;  %967 = vmatprep.mubr.msk.f32.mxu1 %vm269_vm0, %v250_v22 }
  0x2b   : > { %944 = vmatmul.mubr.msk.f32.gmra.mxu0 %vm269_vm0, %v235_v23  ;;  %968 = vmatmul.mubr.msk.f32.gmra.mxu1 %vm269_vm0, %v251_v24 }
  0x2c   : > { %946 = vmatprep.mubr.msk.f32.mxu0 %vm269_vm0, %v236_v25  ;;  %970 = vmatprep.mubr.msk.f32.mxu1 %vm269_vm0, %v252_v26 }
  0x2f   : > { %947 = vmatmul.mubr.msk.f32.gmra.mxu0 %vm269_vm0, %v237_v27  ;;  %971 = vmatmul.mubr.msk.f32.gmra.mxu1 %vm269_vm0, %v253_v28 }
  0x30   : > { %949 = vmatprep.mubr.msk.f32.mxu0 %vm269_vm0, %v238_v29  ;;  %973 = vmatprep.mubr.msk.f32.mxu1 %vm269_vm0, %v254_v30 }
  0x33   : > { %950 = vmatmul.mubr.msk.f32.gmra.mxu0 %vm269_vm0, %v239_v31  ;;  %974 = vmatmul.mubr.msk.f32.gmra.mxu1 %vm269_vm0, %v255_v32 }
  0x34   : > { %952 = vmatprep.mubr.msk.f32.mxu0 %vm269_vm0, %v240_v33  ;;  %976 = vmatprep.mubr.msk.f32.mxu1 %vm269_vm0, %v256_v34 }
  0x37   : > { %953 = vmatmul.mubr.msk.f32.gmra.mxu0 %vm269_vm0, %v241_v35  ;;  %977 = vmatmul.mubr.msk.f32.gmra.mxu1 %vm269_vm0, %v257_v36 }
  0x38   : > { %955 = vmatprep.mubr.msk.f32.mxu0 %vm269_vm0, %v242_v37  ;;  %979 = vmatprep.mubr.msk.f32.mxu1 %vm269_vm0, %v258_v38 }
  0x3b   : > { %956 = vmatmul.mubr.msk.f32.gmra.mxu0 %vm269_vm0, %v243_v39  ;;  %980 = vmatmul.mubr.msk.f32.gmra.mxu1 %vm269_vm0, %v259_v40 }
  0xdf   : > { %v936_v48 = vpop.f32.mrf.mxu0  ;;  %v960_v51 = vpop.f32.mrf.mxu1 }
  0xe0   : > { %v599_v52 = vmul.f32 %v936_v48, %v1163_v47  ;;  %v615_v53 = vmul.f32 %v960_v51, %v1163_v47 }
  0xe1   : > { %v432_v54 = vpop.f32.mrf.mxu0  ;;  %v512_v55 = vpop.f32.mrf.mxu1 }
  0xe2   : > { %v638_v56 = vadd.f32 %v1168_v49, %v599_v52  ;;  %v654_v57 = vadd.f32 %v1168_v49, %v615_v53  ;;  %v598_v58 = vmul.f32 %v1163_v47, %v432_v54  ;;  %v614_v59 = vmul.f32 %v1163_v47, %v512_v55 }
  0xe3   : > { %v939_v60 = vpop.f32.mrf.mxu0  ;;  %v963_v61 = vpop.f32.mrf.mxu1 }
  0xe4   : > { %v672_v62 = vmax.f32 %v638_v56, 0.0  ;;  %v688_v63 = vmax.f32 %v654_v57, 0.0  ;;  %v637_v0 = vadd.f32 %v1168_v49, %v598_v58  ;;  %v653_v1 = vadd.f32 %v1168_v49, %v614_v59 }
  0xe5   : > { %v601_v2 = vmul.f32 %v939_v60, %v1163_v47  ;;  %v617_v3 = vmul.f32 %v963_v61, %v1163_v47  ;;  %v442_v4 = vpop.f32.mrf.mxu0  ;;  %v522_v5 = vpop.f32.mrf.mxu1 }
  0xe6   : > { %v710_v6 = vsel %vm708_vm2, %v672_v62, %v638_v56  ;;  %v726_v7 = vsel %vm708_vm2, %v688_v63, %v654_v57  ;;  %v671_v8 = vmax.f32 %v637_v0, 0.0  ;;  %v687_v9 = vmax.f32 %v653_v1, 0.0 }
  0xe7   : > { %743 = vst.msk [vmem:[%s1184_s28 + $0x8] sm:$0xff] %vm741_vm3, %v710_v6  ;;  %759 = vst.msk [vmem:[%s1184_s28 + $0x88] sm:$0xff] %vm741_vm3, %v726_v7  ;;  %v640_v10 = vadd.f32 %v1168_v49, %v601_v2  ;;  %v656_v11 = vadd.f32 %v1168_v49, %v617_v3  ;;  %v600_v12 = vmul.f32 %v1163_v47, %v442_v4  ;;  %v942_v14 = vpop.f32.mrf.mxu0  ;;  %v966_v15 = vpop.f32.mrf.mxu1 }
  0xe8   : > { %v616_v13 = vmul.f32 %v1163_v47, %v522_v5  ;;  %v709_v16 = vsel %vm708_vm2, %v671_v8, %v637_v0  ;;  %v725_v17 = vsel %vm708_vm2, %v687_v9, %v653_v1  ;;  %v603_v18 = vmul.f32 %v942_v14, %v1163_v47 }
  0xe9   : > { %v619_v19 = vmul.f32 %v966_v15, %v1163_v47  ;;  %742 = vst.msk [vmem:[%s1184_s28] sm:$0xff] %vm741_vm3, %v709_v16  ;;  %758 = vst.msk [vmem:[%s1184_s28 + $0x80] sm:$0xff] %vm741_vm3, %v725_v17  ;;  %v674_v20 = vmax.f32 %v640_v10, 0.0  ;;  %v690_v21 = vmax.f32 %v656_v11, 0.0  ;;  %v639_v22 = vadd.f32 %v1168_v49, %v600_v12  ;;  %v452_v24 = vpop.f32.mrf.mxu0  ;;  %v532_v25 = vpop.f32.mrf.mxu1 }
  0xea   : > { %v655_v23 = vadd.f32 %v1168_v49, %v616_v13  ;;  %v642_v26 = vadd.f32 %v1168_v49, %v603_v18  ;;  %v602_v28 = vmul.f32 %v1163_v47, %v452_v24  ;;  %v618_v29 = vmul.f32 %v1163_v47, %v532_v25 }
  0xeb   : > { %v658_v27 = vadd.f32 %v1168_v49, %v619_v19  ;;  %v712_v30 = vsel %vm708_vm2, %v674_v20, %v640_v10  ;;  %v728_v31 = vsel %vm708_vm2, %v690_v21, %v656_v11  ;;  %v673_v32 = vmax.f32 %v639_v22, 0.0  ;;  %v945_v34 = vpop.f32.mrf.mxu0  ;;  %v969_v35 = vpop.f32.mrf.mxu1 }
  0xec   : > { %v689_v33 = vmax.f32 %v655_v23, 0.0  ;;  %745 = vst.msk [vmem:[%s1184_s28 + $0x18] sm:$0xff] %vm741_vm3, %v712_v30  ;;  %761 = vst.msk [vmem:[%s1184_s28 + $0x98] sm:$0xff] %vm741_vm3, %v728_v31  ;;  %v676_v36 = vmax.f32 %v642_v26, 0.0  ;;  %v641_v38 = vadd.f32 %v1168_v49, %v602_v28  ;;  %v657_v39 = vadd.f32 %v1168_v49, %v618_v29 }
  0xed   : > { %v692_v37 = vmax.f32 %v658_v27, 0.0  ;;  %v711_v40 = vsel %vm708_vm2, %v673_v32, %v639_v22  ;;  %v605_v42 = vmul.f32 %v945_v34, %v1163_v47  ;;  %v621_v43 = vmul.f32 %v969_v35, %v1163_v47  ;;  %v462_v44 = vpop.f32.mrf.mxu0  ;;  %v542_v45 = vpop.f32.mrf.mxu1 }
  0xee   : > { %v727_v41 = vsel %vm708_vm2, %v689_v33, %v655_v23  ;;  %744 = vst.msk [vmem:[%s1184_s28 + $0x10] sm:$0xff] %vm741_vm3, %v711_v40  ;;  %v714_v46 = vsel %vm708_vm2, %v676_v36, %v642_v26  ;;  %v675_v51 = vmax.f32 %v641_v38, 0.0  ;;  %v691_v52 = vmax.f32 %v657_v39, 0.0 }
  0xef   : > { %760 = vst.msk [vmem:[%s1184_s28 + $0x90] sm:$0xff] %vm741_vm3, %v727_v41  ;;  %v730_v48 = vsel %vm708_vm2, %v692_v37, %v658_v27  ;;  %747 = vst.msk [vmem:[%s1184_s28 + $0x28] sm:$0xff] %vm741_vm3, %v714_v46  ;;  %v644_v53 = vadd.f32 %v1168_v49, %v605_v42  ;;  %v660_v54 = vadd.f32 %v1168_v49, %v621_v43  ;;  %v948_v57 = vpop.f32.mrf.mxu0  ;;  %v972_v58 = vpop.f32.mrf.mxu1 }
  0xf0   : > { %763 = vst.msk [vmem:[%s1184_s28 + $0xa8] sm:$0xff] %vm741_vm3, %v730_v48  ;;  %v604_v55 = vmul.f32 %v1163_v47, %v462_v44  ;;  %v620_v56 = vmul.f32 %v1163_v47, %v542_v45  ;;  %v713_v59 = vsel %vm708_vm2, %v675_v51, %v641_v38  ;;  %v729_v60 = vsel %vm708_vm2, %v691_v52, %v657_v39 }
  0xf1   : > { %v607_v61 = vmul.f32 %v948_v57, %v1163_v47  ;;  %v623_v62 = vmul.f32 %v972_v58, %v1163_v47  ;;  %746 = vst.msk [vmem:[%s1184_s28 + $0x20] sm:$0xff] %vm741_vm3, %v713_v59  ;;  %762 = vst.msk [vmem:[%s1184_s28 + $0xa0] sm:$0xff] %vm741_vm3, %v729_v60  ;;  %v678_v63 = vmax.f32 %v644_v53, 0.0  ;;  %v694_v0 = vmax.f32 %v660_v54, 0.0  ;;  %v472_v3 = vpop.f32.mrf.mxu0  ;;  %v552_v4 = vpop.f32.mrf.mxu1 }
  0xf2   : > { %v643_v1 = vadd.f32 %v1168_v49, %v604_v55  ;;  %v659_v2 = vadd.f32 %v1168_v49, %v620_v56  ;;  %v606_v7 = vmul.f32 %v1163_v47, %v472_v3  ;;  %v622_v8 = vmul.f32 %v1163_v47, %v552_v4 }
  0xf3   : > { %v646_v5 = vadd.f32 %v1168_v49, %v607_v61  ;;  %v662_v6 = vadd.f32 %v1168_v49, %v623_v62  ;;  %v716_v9 = vsel %vm708_vm2, %v678_v63, %v644_v53  ;;  %v732_v10 = vsel %vm708_vm2, %v694_v0, %v660_v54  ;;  %v951_v13 = vpop.f32.mrf.mxu0  ;;  %v975_v14 = vpop.f32.mrf.mxu1 }
  0xf4   : > { %v677_v11 = vmax.f32 %v643_v1, 0.0  ;;  %v693_v12 = vmax.f32 %v659_v2, 0.0  ;;  %749 = vst.msk [vmem:[%s1184_s28 + $0x38] sm:$0xff] %vm741_vm3, %v716_v9  ;;  %765 = vst.msk [vmem:[%s1184_s28 + $0xb8] sm:$0xff] %vm741_vm3, %v732_v10  ;;  %v645_v17 = vadd.f32 %v1168_v49, %v606_v7  ;;  %v661_v18 = vadd.f32 %v1168_v49, %v622_v8 }
  0xf5   : > { %v680_v15 = vmax.f32 %v646_v5, 0.0  ;;  %v696_v16 = vmax.f32 %v662_v6, 0.0  ;;  %v609_v21 = vmul.f32 %v951_v13, %v1163_v47  ;;  %v625_v22 = vmul.f32 %v975_v14, %v1163_v47  ;;  %v482_v23 = vpop.f32.mrf.mxu0  ;;  %v562_v24 = vpop.f32.mrf.mxu1 }
  0xf6   : > { %v715_v19 = vsel %vm708_vm2, %v677_v11, %v643_v1  ;;  %v731_v20 = vsel %vm708_vm2, %v693_v12, %v659_v2  ;;  %v679_v27 = vmax.f32 %v645_v17, 0.0  ;;  %v695_v28 = vmax.f32 %v661_v18, 0.0 }
  0xf7   : > { %748 = vst.msk [vmem:[%s1184_s28 + $0x30] sm:$0xff] %vm741_vm3, %v715_v19  ;;  %764 = vst.msk [vmem:[%s1184_s28 + $0xb0] sm:$0xff] %vm741_vm3, %v731_v20  ;;  %v718_v25 = vsel %vm708_vm2, %v680_v15, %v646_v5  ;;  %v734_v26 = vsel %vm708_vm2, %v696_v16, %v662_v6  ;;  %v648_v29 = vadd.f32 %v1168_v49, %v609_v21  ;;  %v954_v33 = vpop.f32.mrf.mxu0  ;;  %v978_v34 = vpop.f32.mrf.mxu1 }
  0xf8   : > { %751 = vst.msk [vmem:[%s1184_s28 + $0x48] sm:$0xff] %vm741_vm3, %v718_v25  ;;  %767 = vst.msk [vmem:[%s1184_s28 + $0xc8] sm:$0xff] %vm741_vm3, %v734_v26  ;;  %v664_v30 = vadd.f32 %v1168_v49, %v625_v22  ;;  %v608_v31 = vmul.f32 %v1163_v47, %v482_v23  ;;  %v624_v32 = vmul.f32 %v1163_v47, %v562_v24 }
  0xf9   : > { %v717_v35 = vsel %vm708_vm2, %v679_v27, %v645_v17  ;;  %v733_v36 = vsel %vm708_vm2, %v695_v28, %v661_v18  ;;  %v611_v37 = vmul.f32 %v954_v33, %v1163_v47  ;;  %v627_v38 = vmul.f32 %v978_v34, %v1163_v47  ;;  %v492_v43 = vpop.f32.mrf.mxu0  ;;  %v572_v44 = vpop.f32.mrf.mxu1 }
  0xfa   : > { %750 = vst.msk [vmem:[%s1184_s28 + $0x40] sm:$0xff] %vm741_vm3, %v717_v35  ;;  %766 = vst.msk [vmem:[%s1184_s28 + $0xc0] sm:$0xff] %vm741_vm3, %v733_v36  ;;  %v682_v39 = vmax.f32 %v648_v29, 0.0  ;;  %v698_v40 = vmax.f32 %v664_v30, 0.0  ;;  %v647_v41 = vadd.f32 %v1168_v49, %v608_v31  ;;  %v663_v42 = vadd.f32 %v1168_v49, %v624_v32 }
  0xfb   : > { %v650_v45 = vadd.f32 %v1168_v49, %v611_v37  ;;  %v666_v46 = vadd.f32 %v1168_v49, %v627_v38  ;;  %v610_v48 = vmul.f32 %v1163_v47, %v492_v43  ;;  %v626_v51 = vmul.f32 %v1163_v47, %v572_v44  ;;  %v957_v56 = vpop.f32.mrf.mxu0  ;;  %v981_v57 = vpop.f32.mrf.mxu1 }
  0xfc   : > { %v720_v52 = vsel %vm708_vm2, %v682_v39, %v648_v29  ;;  %v736_v53 = vsel %vm708_vm2, %v698_v40, %v664_v30  ;;  %v681_v54 = vmax.f32 %v647_v41, 0.0  ;;  %v697_v55 = vmax.f32 %v663_v42, 0.0 }
  0xfd   : > { %753 = vst.msk [vmem:[%s1184_s28 + $0x58] sm:$0xff] %vm741_vm3, %v720_v52  ;;  %769 = vst.msk [vmem:[%s1184_s28 + $0xd8] sm:$0xff] %vm741_vm3, %v736_v53  ;;  %v684_v58 = vmax.f32 %v650_v45, 0.0  ;;  %v700_v59 = vmax.f32 %v666_v46, 0.0  ;;  %v649_v60 = vadd.f32 %v1168_v49, %v610_v48  ;;  %v665_v61 = vadd.f32 %v1168_v49, %v626_v51  ;;  %v502_v2 = vpop.f32.mrf.mxu0  ;;  %v582_v3 = vpop.f32.mrf.mxu1 }
  0xfe   : > { %v719_v62 = vsel %vm708_vm2, %v681_v54, %v647_v41  ;;  %v735_v63 = vsel %vm708_vm2, %v697_v55, %v663_v42  ;;  %v613_v0 = vmul.f32 %v957_v56, %v1163_v47  ;;  %v629_v1 = vmul.f32 %v981_v57, %v1163_v47 }
  0xff   : > { %752 = vst.msk [vmem:[%s1184_s28 + $0x50] sm:$0xff] %vm741_vm3, %v719_v62  ;;  %768 = vst.msk [vmem:[%s1184_s28 + $0xd0] sm:$0xff] %vm741_vm3, %v735_v63  ;;  %v722_v4 = vsel %vm708_vm2, %v684_v58, %v650_v45  ;;  %v738_v5 = vsel %vm708_vm2, %v700_v59, %v666_v46  ;;  %v683_v6 = vmax.f32 %v649_v60, 0.0  ;;  %v699_v7 = vmax.f32 %v665_v61, 0.0 }
 0x100   : > { %755 = vst.msk [vmem:[%s1184_s28 + $0x68] sm:$0xff] %vm741_vm3, %v722_v4  ;;  %771 = vst.msk [vmem:[%s1184_s28 + $0xe8] sm:$0xff] %vm741_vm3, %v738_v5  ;;  %v652_v8 = vadd.f32 %v1168_v49, %v613_v0  ;;  %v668_v9 = vadd.f32 %v1168_v49, %v629_v1  ;;  %v612_v10 = vmul.f32 %v1163_v47, %v502_v2 }
 0x101   : > { %v628_v11 = vmul.f32 %v1163_v47, %v582_v3  ;;  %v721_v12 = vsel %vm708_vm2, %v683_v6, %v649_v60  ;;  %v737_v13 = vsel %vm708_vm2, %v699_v7, %v665_v61 }
 0x102   : > { %754 = vst.msk [vmem:[%s1184_s28 + $0x60] sm:$0xff] %vm741_vm3, %v721_v12  ;;  %770 = vst.msk [vmem:[%s1184_s28 + $0xe0] sm:$0xff] %vm741_vm3, %v737_v13  ;;  %v686_v14 = vmax.f32 %v652_v8, 0.0  ;;  %v702_v15 = vmax.f32 %v668_v9, 0.0  ;;  %v651_v16 = vadd.f32 %v1168_v49, %v612_v10 }
 0x103   : > { %v667_v17 = vadd.f32 %v1168_v49, %v628_v11 }
 0x104   : > { %v724_v47 = vsel %vm708_vm2, %v686_v14, %v652_v8  ;;  %v740_v18 = vsel %vm708_vm2, %v702_v15, %v668_v9  ;;  %v685_v19 = vmax.f32 %v651_v16, 0.0 }
 0x105   : > { %v701_v20 = vmax.f32 %v667_v17, 0.0  ;;  %757 = vst.msk [vmem:[%s1184_s28 + $0x78] sm:$0xff] %vm741_vm3, %v724_v47  ;;  %773 = vst.msk [vmem:[%s1184_s28 + $0xf8] sm:$0xff] %vm741_vm3, %v740_v18 }
 0x106   : > { %v723_v21 = vsel %vm708_vm2, %v685_v19, %v651_v16 }
 0x107   : > { %v739_v22 = vsel %vm708_vm2, %v701_v20, %v667_v17  ;;  %756 = vst.msk [vmem:[%s1184_s28 + $0x70] sm:$0xff] %vm741_vm3, %v723_v21 }
 0x108   : > { %772 = vst.msk [vmem:[%s1184_s28 + $0xf0] sm:$0xff] %vm741_vm3, %v739_v22 }
 0x109 PF: > { %s15_s18 = sadd.s32 1, %s1015_s18  }
 0x10a   : > { %p12_p4 = scmp.ge.s32.totalorder %s15_s18, 4  }
 0x10c   :  { %14 = sbr.rel (!%p12_p4) target bundleno = 1 (0x1), region = 70 }

// kernel: res_conv_block_forward.5
= control target key start
LH: loop header
LB: loop body
LE: loop exit
PB: predicated region body
PF: predicated region fallthrough
CT: control target
= control target key end

     0   :  { %s856_s12 = smov 0   ;;  %s1310_s0 = inlined_call_operand.vmem [shape: f32[2,256,16], index: 0, kind: input, shape index: {}]   ;;  %s1311_s1 = inlined_call_operand.vmem [shape: f32[2,1,16], index: 1, kind: input, shape index: {}]   ;;  %s1312_s2 = inlined_call_operand.vmem [shape: f32[2,256,16], index: 2, kind: input, shape index: {}]   ;;  %s1313_s3 = inlined_call_operand.vmem [shape: f32[2,256,8], index: 3, kind: output, shape index: {}]  }
   0x1 LB: > { %s801_s13 = sadd.s32 4294967295, %s833_s12   ;;  %p805_p0 = scmp.ge.s32.totalorder %s833_s12, 1  ;;  %s833_s12 = sphi %s856_s12, %s13_s12  }
   0x2   : > { %p155_p1 = scmp.lt.s32.totalorder %s833_s12, 3 }
   0x4   : > { %p156_p2 = pnand %p805_p0, %p155_p1 }
   0x6   : > { %159 = sbr.rel (%p156_p2) target bundleno = 263 (0x107), region = 32 }
   0xb   : > { %p187_p3 = scmp.lt.s32.totalorder %s801_s13, 1  ;;  %s835_s21 = smov 120   ;;  %vm692_vm0 = vcmask 64512  }
   0xd   : > { %s1343_s13 = smov (!%p187_p3, %s801_s13), 1 }
   0xe   : > { %s864_s14 = sshll.u32 %s1343_s13, 8  ;;  %s194_s17 = scalar_lea.vmem %s1311_s1, %s1343_s13 }
   0xf   : > { %s873_s20 = scalar_lea.vmem %s1310_s0, %s864_s14  ;;  %v875_v0 = vld [vmem:[%s194_s17] ss:$0 sm:$0xff]  ;;  %s1069_s24 = scalar_lea.vmem %s1312_s2, %s864_s14 }
  0x10   : > { %v207_v1 = vld [vmem:[%s873_s20 + $0x10] sm:$0xff]  ;;  %v205_v2 = vld [vmem:[%s873_s20] sm:$0xff]  ;;  %v208_v3 = vld [vmem:[%s873_s20 + $0x18] sm:$0xff]  ;;  %s1193_s27 = scalar_lea.vmem %s1313_s3, %s864_s14 }
  0x11   : > { %v881_v4 = vmul.f32 %v875_v0, %v207_v1  ;;  %v884_v5 = vmul.f32 %v875_v0, %v205_v2  ;;  %v206_v6 = vld [vmem:[%s873_s20 + $0x8] sm:$0xff]  ;;  %v892_v7 = vmul.f32 %v875_v0, %v208_v3  ;;  %v209_v10 = vld [vmem:[%s873_s20 + $0x20] sm:$0xff]  ;;  %v212_v13 = vld [vmem:[%s873_s20 + $0x38] sm:$0xff] }
  0x12   : > { %v895_v8 = vmul.f32 %v875_v0, %v206_v6  ;;  %v210_v9 = vld [vmem:[%s873_s20 + $0x28] sm:$0xff]  ;;  %v907_v12 = vmul.f32 %v875_v0, %v209_v10  ;;  %v211_v14 = vld [vmem:[%s873_s20 + $0x30] sm:$0xff]  ;;  %v916_v15 = vmul.f32 %v875_v0, %v212_v13  ;;  %v213_v18 = vld [vmem:[%s873_s20 + $0x40] sm:$0xff] }
  0x13   : > { %312 = vrot.lane.b32.xlu1 %v881_v4, %s835_s21  ;;  %308 = vrot.lane.b32.xlu0 %v884_v5, %s835_s21  ;;  %v904_v11 = vmul.f32 %v875_v0, %v210_v9  ;;  %v919_v16 = vmul.f32 %v875_v0, %v211_v14  ;;  %v214_v17 = vld [vmem:[%s873_s20 + $0x48] sm:$0xff]  ;;  %v931_v20 = vmul.f32 %v875_v0, %v213_v18  ;;  %v216_v21 = vld [vmem:[%s873_s20 + $0x58] sm:$0xff] }
  0x14   : > { %v928_v19 = vmul.f32 %v875_v0, %v214_v17  ;;  %v215_v22 = vld [vmem:[%s873_s20 + $0x50] sm:$0xff]  ;;  %v940_v23 = vmul.f32 %v875_v0, %v216_v21  ;;  %v218_v25 = vld [vmem:[%s873_s20 + $0x68] sm:$0xff]  ;;  %v217_v26 = vld [vmem:[%s873_s20 + $0x60] sm:$0xff] }
  0x15   : > { %v943_v24 = vmul.f32 %v875_v0, %v215_v22  ;;  %v952_v27 = vmul.f32 %v875_v0, %v218_v25  ;;  %v955_v28 = vmul.f32 %v875_v0, %v217_v26  ;;  %v220_v29 = vld [vmem:[%s873_s20 + $0x78] sm:$0xff]  ;;  %v219_v30 = vld [vmem:[%s873_s20 + $0x70] sm:$0xff]  ;;  %v222_v33 = vld [vmem:[%s873_s20 + $0x88] sm:$0xff] }
  0x16   : > { %v964_v31 = vmul.f32 %v875_v0, %v220_v29  ;;  %v967_v32 = vmul.f32 %v875_v0, %v219_v30  ;;  %v221_v34 = vld [vmem:[%s873_s20 + $0x80] sm:$0xff]  ;;  %v976_v35 = vmul.f32 %v875_v0, %v222_v33  ;;  %v224_v37 = vld [vmem:[%s873_s20 + $0x98] sm:$0xff]  ;;  %v223_v38 = vld [vmem:[%s873_s20 + $0x90] sm:$0xff] }
  0x17   : > { %314 = vrot.lane.b32.xlu1 %v892_v7, %s835_s21  ;;  %310 = vrot.lane.b32.xlu0 %v895_v8, %s835_s21  ;;  %v979_v36 = vmul.f32 %v875_v0, %v221_v34  ;;  %v988_v39 = vmul.f32 %v875_v0, %v224_v37  ;;  %v991_v40 = vmul.f32 %v875_v0, %v223_v38  ;;  %v226_v41 = vld [vmem:[%s873_s20 + $0xa8] sm:$0xff]  ;;  %v225_v42 = vld [vmem:[%s873_s20 + $0xa0] sm:$0xff] }
  0x18   : > { %v1000_v43 = vmul.f32 %v875_v0, %v226_v41  ;;  %v1003_v44 = vmul.f32 %v875_v0, %v225_v42  ;;  %v228_v45 = vld [vmem:[%s873_s20 + $0xb8] sm:$0xff]  ;;  %v227_v46 = vld [vmem:[%s873_s20 + $0xb0] sm:$0xff]  ;;  %v230_v49 = vld [vmem:[%s873_s20 + $0xc8] sm:$0xff] }
  0x19   : > { %v1012_v47 = vmul.f32 %v875_v0, %v228_v45  ;;  %v1015_v48 = vmul.f32 %v875_v0, %v227_v46  ;;  %v229_v50 = vld [vmem:[%s873_s20 + $0xc0] sm:$0xff]  ;;  %v1024_v51 = vmul.f32 %v875_v0, %v230_v49  ;;  %v232_v53 = vld [vmem:[%s873_s20 + $0xd8] sm:$0xff]  ;;  %v231_v54 = vld [vmem:[%s873_s20 + $0xd0] sm:$0xff] }
  0x1a   : > { %v1027_v52 = vmul.f32 %v875_v0, %v229_v50  ;;  %v1036_v55 = vmul.f32 %v875_v0, %v232_v53  ;;  %v1039_v56 = vmul.f32 %v875_v0, %v231_v54  ;;  %v234_v57 = vld [vmem:[%s873_s20 + $0xe8] sm:$0xff]  ;;  %v233_v58 = vld [vmem:[%s873_s20 + $0xe0] sm:$0xff]  ;;  %v236_v61 = vld [vmem:[%s873_s20 + $0xf8] sm:$0xff] }
  0x1b   : > { %318 = vrot.lane.b32.xlu1 %v904_v11, %s835_s21  ;;  %316 = vrot.lane.b32.xlu0 %v907_v12, %s835_s21  ;;  %v1048_v59 = vmul.f32 %v875_v0, %v234_v57  ;;  %v1051_v60 = vmul.f32 %v875_v0, %v233_v58  ;;  %v235_v62 = vld [vmem:[%s873_s20 + $0xf0] sm:$0xff]  ;;  %v1060_v63 = vmul.f32 %v875_v0, %v236_v61  ;;  %v468_v2 = vld [vmem:[%s1069_s24] sm:$0xff] }
  0x1c   : > { %1320 = vst [vmem:[#allocation2_spill] sm:$0xff] %v1036_v55  ;;  %1321 = vst [vmem:[#allocation3_spill] sm:$0xff] %v1039_v56  ;;  %v1063_v1 = vmul.f32 %v875_v0, %v235_v62  ;;  %v469_v0 = vld [vmem:[%s1069_s24 + $0x8] sm:$0xff]  ;;  %v471_v3 = vld [vmem:[%s1069_s24 + $0x18] sm:$0xff] }
  0x1d   : > { %1322 = vst [vmem:[#allocation4_spill] sm:$0xff] %v1048_v59  ;;  %1323 = vst [vmem:[#allocation5_spill] sm:$0xff] %v1051_v60  ;;  %v470_v6 = vld [vmem:[%s1069_s24 + $0x10] sm:$0xff]  ;;  %v473_v9 = vld [vmem:[%s1069_s24 + $0x28] sm:$0xff] }
  0x1e   : > { %1324 = vst [vmem:[#allocation6_spill] sm:$0xff] %v1060_v63  ;;  %1325 = vst [vmem:[#allocation7_spill] sm:$0xff] %v1063_v1  ;;  %v472_v10 = vld [vmem:[%s1069_s24 + $0x20] sm:$0xff]  ;;  %v475_v13 = vld [vmem:[%s1069_s24 + $0x38] sm:$0xff] }
  0x1f   : > { %322 = vrot.lane.b32.xlu1 %v916_v15, %s835_s21  ;;  %320 = vrot.lane.b32.xlu0 %v919_v16, %s835_s21  ;;  %v474_v14 = vld [vmem:[%s1069_s24 + $0x30] sm:$0xff]  ;;  %v477_v17 = vld [vmem:[%s1069_s24 + $0x48] sm:$0xff] }
  0x20   : > { %v476_v18 = vld [vmem:[%s1069_s24 + $0x40] sm:$0xff]  ;;  %v479_v21 = vld [vmem:[%s1069_s24 + $0x58] sm:$0xff]  ;;  %v478_v22 = vld [vmem:[%s1069_s24 + $0x50] sm:$0xff] }
  0x21   : > { %v481_v25 = vld [vmem:[%s1069_s24 + $0x68] sm:$0xff]  ;;  %v480_v26 = vld [vmem:[%s1069_s24 + $0x60] sm:$0xff]  ;;  %v483_v29 = vld [vmem:[%s1069_s24 + $0x78] sm:$0xff] }
  0x22   : > { %v482_v30 = vld [vmem:[%s1069_s24 + $0x70] sm:$0xff]  ;;  %v485_v33 = vld [vmem:[%s1069_s24 + $0x88] sm:$0xff]  ;;  %v484_v34 = vld [vmem:[%s1069_s24 + $0x80] sm:$0xff] }
  0x23   : > { %326 = vrot.lane.b32.xlu1 %v928_v19, %s835_s21  ;;  %324 = vrot.lane.b32.xlu0 %v931_v20, %s835_s21  ;;  %v487_v37 = vld [vmem:[%s1069_s24 + $0x98] sm:$0xff]  ;;  %v486_v38 = vld [vmem:[%s1069_s24 + $0x90] sm:$0xff] }
  0x24   : > { %v489_v41 = vld [vmem:[%s1069_s24 + $0xa8] sm:$0xff]  ;;  %v488_v42 = vld [vmem:[%s1069_s24 + $0xa0] sm:$0xff]  ;;  %v491_v45 = vld [vmem:[%s1069_s24 + $0xb8] sm:$0xff] }
  0x25   : > { %v490_v46 = vld [vmem:[%s1069_s24 + $0xb0] sm:$0xff]  ;;  %v493_v49 = vld [vmem:[%s1069_s24 + $0xc8] sm:$0xff]  ;;  %v492_v50 = vld [vmem:[%s1069_s24 + $0xc0] sm:$0xff] }
  0x26   : > { %v495_v53 = vld [vmem:[%s1069_s24 + $0xd8] sm:$0xff]  ;;  %v494_v54 = vld [vmem:[%s1069_s24 + $0xd0] sm:$0xff]  ;;  %v497_v61 = vld [vmem:[%s1069_s24 + $0xe8] sm:$0xff] }
  0x27   : > { %330 = vrot.lane.b32.xlu1 %v940_v23, %s835_s21  ;;  %328 = vrot.lane.b32.xlu0 %v943_v24, %s835_s21  ;;  %v496_v62 = vld [vmem:[%s1069_s24 + $0xe0] sm:$0xff] }
  0x2b   : > { %334 = vrot.lane.b32.xlu1 %v952_v27, %s835_s21  ;;  %332 = vrot.lane.b32.xlu0 %v955_v28, %s835_s21 }
  0x2f   : > { %338 = vrot.lane.b32.xlu1 %v964_v31, %s835_s21  ;;  %336 = vrot.lane.b32.xlu0 %v967_v32, %s835_s21 }
  0x33   : > { %342 = vrot.lane.b32.xlu1 %v976_v35, %s835_s21  ;;  %340 = vrot.lane.b32.xlu0 %v979_v36, %s835_s21 }
  0x37   : > { %346 = vrot.lane.b32.xlu1 %v988_v39, %s835_s21  ;;  %344 = vrot.lane.b32.xlu0 %v991_v40, %s835_s21 }
  0x3b   : > { %350 = vrot.lane.b32.xlu1 %v1000_v43, %s835_s21  ;;  %348 = vrot.lane.b32.xlu0 %v1003_v44, %s835_s21 }
  0x3f   : > { %354 = vrot.lane.b32.xlu1 %v1012_v47, %s835_s21  ;;  %352 = vrot.lane.b32.xlu0 %v1015_v48, %s835_s21 }
  0x43   : > { %358 = vrot.lane.b32.xlu1 %v1024_v51, %s835_s21  ;;  %356 = vrot.lane.b32.xlu0 %v1027_v52, %s835_s21 }
  0x47   : > { %362 = vrot.lane.b32.xlu1 %v1036_v55, %s835_s21  ;;  %360 = vrot.lane.b32.xlu0 %v1039_v56, %s835_s21 }
  0x4b   : > { %366 = vrot.lane.b32.xlu1 %v1048_v59, %s835_s21  ;;  %364 = vrot.lane.b32.xlu0 %v1051_v60, %s835_s21 }
  0x4f   : > { %370 = vrot.lane.b32.xlu1 %v1060_v63, %s835_s21  ;;  %368 = vrot.lane.b32.xlu0 %v1063_v1, %s835_s21 }
  0x53   : > { %534 = vrot.lane.b32.xlu1 %v469_v0, %s835_s21  ;;  %532 = vrot.lane.b32.xlu0 %v468_v2, %s835_s21 }
  0x57   : > { %538 = vrot.lane.b32.xlu1 %v471_v3, %s835_s21  ;;  %536 = vrot.lane.b32.xlu0 %v470_v6, %s835_s21  ;;  %v499_v3 = vld [vmem:[%s1069_s24 + $0xf8] sm:$0xff]  ;;  %v498_v6 = vld [vmem:[%s1069_s24 + $0xf0] sm:$0xff] }
  0x5b   : > { %542 = vrot.lane.b32.xlu1 %v473_v9, %s835_s21  ;;  %540 = vrot.lane.b32.xlu0 %v472_v10, %s835_s21 }
  0x5f   : > { %546 = vrot.lane.b32.xlu1 %v475_v13, %s835_s21  ;;  %544 = vrot.lane.b32.xlu0 %v474_v14, %s835_s21 }
  0x63   : > { %550 = vrot.lane.b32.xlu1 %v477_v17, %s835_s21  ;;  %548 = vrot.lane.b32.xlu0 %v476_v18, %s835_s21 }
  0x67   : > { %554 = vrot.lane.b32.xlu1 %v479_v21, %s835_s21  ;;  %552 = vrot.lane.b32.xlu0 %v478_v22, %s835_s21 }
  0x6b   : > { %558 = vrot.lane.b32.xlu1 %v481_v25, %s835_s21  ;;  %556 = vrot.lane.b32.xlu0 %v480_v26, %s835_s21 }
  0x6f   : > { %562 = vrot.lane.b32.xlu1 %v483_v29, %s835_s21  ;;  %560 = vrot.lane.b32.xlu0 %v482_v30, %s835_s21 }
  0x73   : > { %566 = vrot.lane.b32.xlu1 %v485_v33, %s835_s21  ;;  %564 = vrot.lane.b32.xlu0 %v484_v34, %s835_s21 }
  0x77   : > { %570 = vrot.lane.b32.xlu1 %v487_v37, %s835_s21  ;;  %568 = vrot.lane.b32.xlu0 %v486_v38, %s835_s21 }
  0x7b   : > { %574 = vrot.lane.b32.xlu1 %v489_v41, %s835_s21  ;;  %572 = vrot.lane.b32.xlu0 %v488_v42, %s835_s21 }
  0x7f   : > { %578 = vrot.lane.b32.xlu1 %v491_v45, %s835_s21  ;;  %576 = vrot.lane.b32.xlu0 %v490_v46, %s835_s21 }
  0x83   : > { %582 = vrot.lane.b32.xlu1 %v493_v49, %s835_s21  ;;  %580 = vrot.lane.b32.xlu0 %v492_v50, %s835_s21 }
  0x85   : > { %v313_v57 = vpop.permute.xlu1 %312  ;;  %v309_v58 = vpop.permute.xlu0 %308 }
  0x86   : > { %v406_v60 = vadd.f32 %v313_v57, %v881_v4 }
  0x87   : > { %586 = vrot.lane.b32.xlu1 %v495_v53, %s835_s21  ;;  %584 = vrot.lane.b32.xlu0 %v494_v54, %s835_s21 }
  0x88   : > { %v438_v4 = vmax.f32 %v406_v60, 0.0 }
  0x89   : > { %v315_v0 = vpop.permute.xlu1 %314  ;;  %v311_v2 = vpop.permute.xlu0 %310 }
  0x8a   : > { %v407_v56 = vadd.f32 %v315_v0, %v892_v7 }
  0x8b   : > { %590 = vrot.lane.b32.xlu1 %v497_v61, %s835_s21  ;;  %588 = vrot.lane.b32.xlu0 %v496_v62, %s835_s21 }
  0x8d   : > { %v319_v9 = vpop.permute.xlu1 %318  ;;  %v317_v10 = vpop.permute.xlu0 %316 }
  0x8f   : > { %594 = vrot.lane.b32.xlu1 %v499_v3, %s835_s21  ;;  %592 = vrot.lane.b32.xlu0 %v498_v6, %s835_s21  ;;  %v404_v3 = vadd.f32 %v309_v58, %v884_v5  ;;  %v405_v6 = vadd.f32 %v311_v2, %v895_v8  ;;  %v408_v5 = vadd.f32 %v317_v10, %v907_v12  ;;  %v439_v8 = vmax.f32 %v407_v56, 0.0 }
  0x91   : > { %v323_v13 = vpop.permute.xlu1 %322  ;;  %v321_v14 = vpop.permute.xlu0 %320  ;;  %v436_v59 = vmax.f32 %v404_v3, 0.0  ;;  %v440_v0 = vmax.f32 %v408_v5, 0.0 }
  0x92   : > { %v411_v2 = vadd.f32 %v323_v13, %v916_v15 }
  0x94   : > { %v443_v3 = vmax.f32 %v411_v2, 0.0 }
  0x95   : > { %v327_v17 = vpop.permute.xlu1 %326  ;;  %v325_v18 = vpop.permute.xlu0 %324 }
  0x99   : > { %v1139_v21 = vpop.permute.xlu1 %330  ;;  %v1141_v22 = vpop.permute.xlu0 %328 }
  0x9d   : > { %v1143_v25 = vpop.permute.xlu1 %334  ;;  %v1145_v26 = vpop.permute.xlu0 %332 }
  0xa1   : > { %v1147_v29 = vpop.permute.xlu1 %338  ;;  %v1149_v30 = vpop.permute.xlu0 %336 }
  0xa5   : > { %v1151_v33 = vpop.permute.xlu1 %342  ;;  %v1153_v34 = vpop.permute.xlu0 %340 }
  0xa9   : > { %v1155_v37 = vpop.permute.xlu1 %346  ;;  %v1157_v38 = vpop.permute.xlu0 %344 }
  0xad   : > { %v1159_v41 = vpop.permute.xlu1 %350  ;;  %v1161_v42 = vpop.permute.xlu0 %348 }
  0xb1   : > { %v1163_v45 = vpop.permute.xlu1 %354  ;;  %v1165_v46 = vpop.permute.xlu0 %352 }
  0xb5   : > { %v1167_v49 = vpop.permute.xlu1 %358  ;;  %v1169_v50 = vpop.permute.xlu0 %356 }
  0xb6   : > { %1326 = vst [vmem:[#allocation8_spill] sm:$0xff] %v1169_v50 }
  0xb9   : > { %v1171_v53 = vpop.permute.xlu1 %362  ;;  %v1173_v54 = vpop.permute.xlu0 %360 }
  0xba   : > { %1327 = vst [vmem:[#allocation9_spill] sm:$0xff] %v1171_v53  ;;  %1328 = vst [vmem:[#allocation10_spill] sm:$0xff] %v1173_v54  ;;  %v437_v53 = vmax.f32 %v405_v6, 0.0 }
  0xbd   : > { %v1175_v61 = vpop.permute.xlu1 %366  ;;  %v1177_v62 = vpop.permute.xlu0 %364 }
  0xbe   : > { %1329 = vst [vmem:[#allocation11_spill] sm:$0xff] %v1175_v61  ;;  %1330 = vst [vmem:[#allocation12_spill] sm:$0xff] %v1177_v62  ;;  %v409_v62 = vadd.f32 %v319_v9, %v904_v11  ;;  %v410_v9 = vadd.f32 %v321_v14, %v919_v16 }
  0xc0   : > { %v442_v15 = vmax.f32 %v410_v9, 0.0 }
  0xc1   : > { %v1181_v1 = vpop.permute.xlu1 %370  ;;  %v1183_v63 = vpop.permute.xlu0 %368 }
  0xc5   : > { %v535_v54 = vpop.permute.xlu1 %534  ;;  %v533_v55 = vpop.permute.xlu0 %532 }
  0xc6   : > { %v629_v61 = vadd.f32 %v535_v54, %v437_v53  ;;  %v628_v50 = vadd.f32 %v533_v55, %v436_v59  ;;  %v441_v59 = vmax.f32 %v409_v62, 0.0  ;;  %v412_v62 = vadd.f32 %v325_v18, %v931_v20 }
  0xc7   : > { %v414_v20 = vadd.f32 %v1141_v22, %v943_v24 }
  0xc8   : > { %v661_v7 = vmax.f32 %v629_v61, 0.0  ;;  %v660_v57 = vmax.f32 %v628_v50, 0.0  ;;  %v413_v61 = vadd.f32 %v327_v17, %v928_v19  ;;  %v415_v19 = vadd.f32 %v1139_v21, %v940_v23 }
  0xc9   : > { %v539_v58 = vpop.permute.xlu1 %538  ;;  %v537_v55 = vpop.permute.xlu0 %536  ;;  %v416_v23 = vadd.f32 %v1145_v26, %v955_v28  ;;  %v446_v24 = vmax.f32 %v414_v20, 0.0  ;;  %v418_v28 = vadd.f32 %v1149_v30, %v967_v32  ;;  %v425_v20 = vadd.f32 %v1159_v41, %v1000_v43 }
  0xca   : > { %694 = vst.msk [vmem:[%s1193_s27 + $0x8] sm:$0xff] %vm692_vm0, %v661_v7  ;;  %693 = vst.msk [vmem:[%s1193_s27] sm:$0xff] %vm692_vm0, %v660_v57  ;;  %v631_v11 = vadd.f32 %v539_v58, %v439_v8  ;;  %v630_v12 = vadd.f32 %v537_v55, %v438_v4  ;;  %v445_v8 = vmax.f32 %v413_v61, 0.0  ;;  %v444_v7 = vmax.f32 %v412_v62, 0.0 }
  0xcb   : > { %v447_v21 = vmax.f32 %v415_v19, 0.0  ;;  %v421_v62 = vadd.f32 %v1151_v33, %v976_v35  ;;  %v450_v32 = vmax.f32 %v418_v28, 0.0  ;;  %v423_v35 = vadd.f32 %v1155_v37, %v988_v39 }
  0xcc   : > { %v663_v60 = vmax.f32 %v631_v11, 0.0  ;;  %v662_v56 = vmax.f32 %v630_v12, 0.0  ;;  %v417_v12 = vadd.f32 %v1143_v25, %v952_v27  ;;  %v419_v27 = vadd.f32 %v1147_v29, %v964_v31 }
  0xcd   : > { %v543_v10 = vpop.permute.xlu1 %542  ;;  %v541_v50 = vpop.permute.xlu0 %540  ;;  %v420_v31 = vadd.f32 %v1153_v34, %v979_v36  ;;  %v422_v36 = vadd.f32 %v1157_v38, %v991_v40  ;;  %v424_v39 = vadd.f32 %v1161_v42, %v1003_v44  ;;  %v455_v37 = vmax.f32 %v423_v35, 0.0 }
  0xce   : > { %696 = vst.msk [vmem:[%s1193_s27 + $0x18] sm:$0xff] %vm692_vm0, %v663_v60  ;;  %695 = vst.msk [vmem:[%s1193_s27 + $0x10] sm:$0xff] %vm692_vm0, %v662_v56  ;;  %v633_v53 = vadd.f32 %v543_v10, %v441_v59  ;;  %v632_v54 = vadd.f32 %v541_v50, %v440_v0  ;;  %v449_v56 = vmax.f32 %v417_v12, 0.0  ;;  %v448_v10 = vmax.f32 %v416_v23, 0.0 }
  0xcf   : > { %v451_v29 = vmax.f32 %v419_v27, 0.0  ;;  %v454_v40 = vmax.f32 %v422_v36, 0.0  ;;  %v456_v12 = vmax.f32 %v424_v39, 0.0  ;;  %v427_v43 = vadd.f32 %v1163_v45, %v1012_v47  ;;  %v1331_v47 = vld [vmem:[#allocation8_spill] sm:$0xff]  ;;  %v1341_v39 = vld [vmem:[#allocation7_spill] sm:$0xff] }
  0xd0   : > { %v665_v13 = vmax.f32 %v633_v53, 0.0  ;;  %v664_v16 = vmax.f32 %v632_v54, 0.0  ;;  %v426_v44 = vadd.f32 %v1165_v46, %v1015_v48  ;;  %v428_v45 = vadd.f32 %v1331_v47, %v1027_v52  ;;  %v1334_v52 = vld [vmem:[#allocation3_spill] sm:$0xff] }
  0xd1   : > { %v547_v14 = vpop.permute.xlu1 %546  ;;  %v545_v6 = vpop.permute.xlu0 %544 }
  0xd2   : > { %698 = vst.msk [vmem:[%s1193_s27 + $0x28] sm:$0xff] %vm692_vm0, %v665_v13  ;;  %697 = vst.msk [vmem:[%s1193_s27 + $0x20] sm:$0xff] %vm692_vm0, %v664_v16  ;;  %v635_v5 = vadd.f32 %v547_v14, %v443_v3  ;;  %v634_v4 = vadd.f32 %v545_v6, %v442_v15  ;;  %v453_v6 = vmax.f32 %v421_v62, 0.0  ;;  %v458_v48 = vmax.f32 %v426_v44, 0.0 }
  0xd3   : > { %v460_v28 = vmax.f32 %v428_v45, 0.0 }
  0xd4   : > { %v667_v17 = vmax.f32 %v635_v5, 0.0  ;;  %v666_v18 = vmax.f32 %v634_v4, 0.0  ;;  %v452_v5 = vmax.f32 %v420_v31, 0.0 }
  0xd5   : > { %v551_v57 = vpop.permute.xlu1 %550  ;;  %v549_v58 = vpop.permute.xlu0 %548 }
  0xd6   : > { %700 = vst.msk [vmem:[%s1193_s27 + $0x38] sm:$0xff] %vm692_vm0, %v667_v17  ;;  %699 = vst.msk [vmem:[%s1193_s27 + $0x30] sm:$0xff] %vm692_vm0, %v666_v18  ;;  %v637_v55 = vadd.f32 %v551_v57, %v445_v8  ;;  %v636_v11 = vadd.f32 %v549_v58, %v444_v7 }
  0xd8   : > { %v669_v22 = vmax.f32 %v637_v55, 0.0  ;;  %v668_v59 = vmax.f32 %v636_v11, 0.0  ;;  %v457_v11 = vmax.f32 %v425_v20, 0.0 }
  0xd9   : > { %v555_v0 = vpop.permute.xlu1 %554  ;;  %v553_v2 = vpop.permute.xlu0 %552 }
  0xda   : > { %702 = vst.msk [vmem:[%s1193_s27 + $0x48] sm:$0xff] %vm692_vm0, %v669_v22  ;;  %701 = vst.msk [vmem:[%s1193_s27 + $0x40] sm:$0xff] %vm692_vm0, %v668_v59  ;;  %v639_v9 = vadd.f32 %v555_v0, %v447_v21  ;;  %v638_v60 = vadd.f32 %v553_v2, %v446_v24  ;;  %v429_v59 = vadd.f32 %v1167_v49, %v1024_v51  ;;  %v459_v0 = vmax.f32 %v427_v43, 0.0  ;;  %v1332_v51 = vld [vmem:[#allocation2_spill] sm:$0xff]  ;;  %v1333_v49 = vld [vmem:[#allocation9_spill] sm:$0xff] }
  0xdc   : > { %v671_v25 = vmax.f32 %v639_v9, 0.0  ;;  %v670_v26 = vmax.f32 %v638_v60, 0.0  ;;  %v461_v27 = vmax.f32 %v429_v59, 0.0 }
  0xdd   : > { %v559_v50 = vpop.permute.xlu1 %558  ;;  %v557_v53 = vpop.permute.xlu0 %556 }
  0xde   : > { %704 = vst.msk [vmem:[%s1193_s27 + $0x58] sm:$0xff] %vm692_vm0, %v671_v25  ;;  %703 = vst.msk [vmem:[%s1193_s27 + $0x50] sm:$0xff] %vm692_vm0, %v670_v26  ;;  %v641_v54 = vadd.f32 %v559_v50, %v449_v56  ;;  %v640_v61 = vadd.f32 %v557_v53, %v448_v10  ;;  %v431_v25 = vadd.f32 %v1333_v49, %v1332_v51  ;;  %v1335_v26 = vld [vmem:[#allocation10_spill] sm:$0xff] }
  0xdf   : > { %v430_v50 = vadd.f32 %v1335_v26, %v1334_v52 }
  0xe0   : > { %v673_v30 = vmax.f32 %v641_v54, 0.0  ;;  %v672_v3 = vmax.f32 %v640_v61, 0.0 }
  0xe1   : > { %v563_v15 = vpop.permute.xlu1 %562  ;;  %v561_v13 = vpop.permute.xlu0 %560 }
  0xe2   : > { %706 = vst.msk [vmem:[%s1193_s27 + $0x68] sm:$0xff] %vm692_vm0, %v673_v30  ;;  %705 = vst.msk [vmem:[%s1193_s27 + $0x60] sm:$0xff] %vm692_vm0, %v672_v3  ;;  %v643_v16 = vadd.f32 %v563_v15, %v451_v29  ;;  %v642_v14 = vadd.f32 %v561_v13, %v450_v32  ;;  %v1336_v32 = vld [vmem:[#allocation4_spill] sm:$0xff]  ;;  %v1337_v30 = vld [vmem:[#allocation11_spill] sm:$0xff] }
  0xe3   : > { %v433_v3 = vadd.f32 %v1337_v30, %v1336_v32  ;;  %v1338_v15 = vld [vmem:[#allocation5_spill] sm:$0xff]  ;;  %v1339_v13 = vld [vmem:[#allocation12_spill] sm:$0xff] }
  0xe4   : > { %v675_v33 = vmax.f32 %v643_v16, 0.0  ;;  %v674_v34 = vmax.f32 %v642_v14, 0.0  ;;  %v432_v16 = vadd.f32 %v1339_v13, %v1338_v15  ;;  %v463_v14 = vmax.f32 %v431_v25, 0.0 }
  0xe5   : > { %v567_v4 = vpop.permute.xlu1 %566  ;;  %v565_v8 = vpop.permute.xlu0 %564 }
  0xe6   : > { %708 = vst.msk [vmem:[%s1193_s27 + $0x78] sm:$0xff] %vm692_vm0, %v675_v33  ;;  %707 = vst.msk [vmem:[%s1193_s27 + $0x70] sm:$0xff] %vm692_vm0, %v674_v34  ;;  %v645_v7 = vadd.f32 %v567_v4, %v453_v6  ;;  %v644_v19 = vadd.f32 %v565_v8, %v452_v5  ;;  %v462_v6 = vmax.f32 %v430_v50, 0.0  ;;  %v465_v8 = vmax.f32 %v433_v3, 0.0 }
  0xe8   : > { %v677_v38 = vmax.f32 %v645_v7, 0.0  ;;  %v676_v17 = vmax.f32 %v644_v19, 0.0  ;;  %v464_v7 = vmax.f32 %v432_v16, 0.0  ;;  %v1340_v19 = vld [vmem:[#allocation6_spill] sm:$0xff] }
  0xe9   : > { %v571_v18 = vpop.permute.xlu1 %570  ;;  %v569_v57 = vpop.permute.xlu0 %568  ;;  %v435_v20 = vadd.f32 %v1181_v1, %v1340_v19 }
  0xea   : > { %710 = vst.msk [vmem:[%s1193_s27 + $0x88] sm:$0xff] %vm692_vm0, %v677_v38  ;;  %709 = vst.msk [vmem:[%s1193_s27 + $0x80] sm:$0xff] %vm692_vm0, %v676_v17  ;;  %v647_v58 = vadd.f32 %v571_v18, %v455_v37  ;;  %v646_v55 = vadd.f32 %v569_v57, %v454_v40  ;;  %v434_v37 = vadd.f32 %v1183_v63, %v1341_v39 }
  0xec   : > { %v679_v41 = vmax.f32 %v647_v58, 0.0  ;;  %v678_v42 = vmax.f32 %v646_v55, 0.0  ;;  %v467_v55 = vmax.f32 %v435_v20, 0.0 }
  0xed   : > { %v575_v23 = vpop.permute.xlu1 %574  ;;  %v573_v21 = vpop.permute.xlu0 %572 }
  0xee   : > { %712 = vst.msk [vmem:[%s1193_s27 + $0x98] sm:$0xff] %vm692_vm0, %v679_v41  ;;  %711 = vst.msk [vmem:[%s1193_s27 + $0x90] sm:$0xff] %vm692_vm0, %v678_v42  ;;  %v649_v24 = vadd.f32 %v575_v23, %v457_v11  ;;  %v648_v22 = vadd.f32 %v573_v21, %v456_v12  ;;  %v466_v11 = vmax.f32 %v434_v37, 0.0 }
  0xf0   : > { %v681_v46 = vmax.f32 %v649_v24, 0.0  ;;  %v680_v2 = vmax.f32 %v648_v22, 0.0 }
  0xf1   : > { %v579_v9 = vpop.permute.xlu1 %578  ;;  %v577_v60 = vpop.permute.xlu0 %576 }
  0xf2   : > { %714 = vst.msk [vmem:[%s1193_s27 + $0xa8] sm:$0xff] %vm692_vm0, %v681_v46  ;;  %713 = vst.msk [vmem:[%s1193_s27 + $0xa0] sm:$0xff] %vm692_vm0, %v680_v2  ;;  %v651_v56 = vadd.f32 %v579_v9, %v459_v0  ;;  %v650_v10 = vadd.f32 %v577_v60, %v458_v48 }
  0xf4   : > { %v683_v53 = vmax.f32 %v651_v56, 0.0  ;;  %v682_v54 = vmax.f32 %v650_v10, 0.0 }
  0xf5   : > { %v583_v61 = vpop.permute.xlu1 %582  ;;  %v581_v62 = vpop.permute.xlu0 %580 }
  0xf6   : > { %716 = vst.msk [vmem:[%s1193_s27 + $0xb8] sm:$0xff] %vm692_vm0, %v683_v53  ;;  %715 = vst.msk [vmem:[%s1193_s27 + $0xb0] sm:$0xff] %vm692_vm0, %v682_v54  ;;  %v653_v31 = vadd.f32 %v583_v61, %v461_v27  ;;  %v652_v29 = vadd.f32 %v581_v62, %v460_v28 }
  0xf8   : > { %v685_v5 = vmax.f32 %v653_v31, 0.0  ;;  %v684_v35 = vmax.f32 %v652_v29, 0.0 }
  0xf9   : > { %v587_v36 = vpop.permute.xlu1 %586  ;;  %v585_v33 = vpop.permute.xlu0 %584 }
  0xfa   : > { %718 = vst.msk [vmem:[%s1193_s27 + $0xc8] sm:$0xff] %vm692_vm0, %v685_v5  ;;  %717 = vst.msk [vmem:[%s1193_s27 + $0xc0] sm:$0xff] %vm692_vm0, %v684_v35  ;;  %v655_v34 = vadd.f32 %v587_v36, %v463_v14  ;;  %v654_v4 = vadd.f32 %v585_v33, %v462_v6 }
  0xfc   : > { %v687_v40 = vmax.f32 %v655_v34, 0.0  ;;  %v686_v38 = vmax.f32 %v654_v4, 0.0 }
  0xfd   : > { %v591_v17 = vpop.permute.xlu1 %590  ;;  %v589_v18 = vpop.permute.xlu0 %588 }
  0xfe   : > { %720 = vst.msk [vmem:[%s1193_s27 + $0xd8] sm:$0xff] %vm692_vm0, %v687_v40  ;;  %719 = vst.msk [vmem:[%s1193_s27 + $0xd0] sm:$0xff] %vm692_vm0, %v686_v38  ;;  %v657_v57 = vadd.f32 %v591_v17, %v465_v8  ;;  %v656_v58 = vadd.f32 %v589_v18, %v464_v7 }
 0x100   : > { %v689_v1 = vmax.f32 %v657_v57, 0.0  ;;  %v688_v12 = vmax.f32 %v656_v58, 0.0 }
 0x101   : > { %v595_v43 = vpop.permute.xlu1 %594  ;;  %v593_v44 = vpop.permute.xlu0 %592 }
 0x102   : > { %722 = vst.msk [vmem:[%s1193_s27 + $0xe8] sm:$0xff] %vm692_vm0, %v689_v1  ;;  %721 = vst.msk [vmem:[%s1193_s27 + $0xe0] sm:$0xff] %vm692_vm0, %v688_v12  ;;  %v659_v63 = vadd.f32 %v595_v43, %v467_v55  ;;  %v658_v41 = vadd.f32 %v593_v44, %v466_v11 }
 0x104   : > { %v691_v42 = vmax.f32 %v659_v63, 0.0  ;;  %v690_v23 = vmax.f32 %v658_v41, 0.0 }
 0x106   : > { %724 = vst.msk [vmem:[%s1193_s27 + $0xf8] sm:$0xff] %vm692_vm0, %v691_v42  ;;  %723 = vst.msk [vmem:[%s1193_s27 + $0xf0] sm:$0xff] %vm692_vm0, %v690_v23 }
 0x107 PF: > { %s13_s12 = sadd.s32 1, %s833_s12  }
 0x108   : > { %p10_p4 = scmp.ge.s32.totalorder %s13_s12, 4  }
 0x10a   :  { %12 = sbr.rel (!%p10_p4) target bundleno = 1 (0x1), region = 68 }

</bundles_post_ra>
